<compile_context>
chip_gen: v6e
topology: v6e:2x2x1
jax: 0.10.0
libtpu: 0.0.40
codegen_flags: <defaults>
</compile_context>

<pallas_src>
from functools import partial

import jax
import jax.numpy as jnp
from jax import lax
from jax.experimental import pallas as pl
from jax.experimental.pallas import tpu as pltpu

EXPANSION = 4
BN_EPS = 1e-5


def _bottleneck_kernel(stride, TR, use_projection, *refs):
    if use_projection:
        (x_ref, w1_ref, b1_ref, w2_ref, b2_ref, w3_ref, b3_ref,
         wsc_ref, bsc_ref, out_ref, pad_ref) = refs
    else:
        (x_ref, w1_ref, b1_ref, w2_ref, b2_ref, w3_ref, b3_ref,
         out_ref, pad_ref) = refs

    nb, H, W, Cin = x_ref.shape
    P = w1_ref.shape[-1]
    Cout = w3_ref.shape[-1]
    Wout = (W + 2 - 3) // stride + 1
    r = pl.program_id(1)

    # ---- Stage 0 (row-tile 0 only): conv1 (1x1) + bn1 + relu for the whole
    # image block, stored bf16 into the zero-padded scratch.  The border is
    # zeroed here too; the interior is fully overwritten every image block, so
    # the border stays valid for all later row tiles / images.
    @pl.when(r == 0)
    def _():
        pad_ref[:, 0:1, :, :] = jnp.zeros((nb, 1, W + 2, P), jnp.bfloat16)
        pad_ref[:, H + 1:H + 2, :, :] = jnp.zeros((nb, 1, W + 2, P),
                                                  jnp.bfloat16)
        pad_ref[:, :, 0:1, :] = jnp.zeros((nb, H + 2, 1, P), jnp.bfloat16)
        pad_ref[:, :, W + 1:W + 2, :] = jnp.zeros((nb, H + 2, 1, P),
                                                  jnp.bfloat16)
        x2d = x_ref[...].reshape(nb * H * W, Cin)
        h1 = jnp.maximum(
            jnp.dot(x2d, w1_ref[...], preferred_element_type=jnp.float32)
            + b1_ref[...], 0.0)
        pad_ref[:, 1:H + 1, 1:W + 1, :] = (
            h1.astype(jnp.bfloat16).reshape(nb, H, W, P))

    # ---- Stage 1 (every step): conv2 (3x3, pad=1, stride=s) + bn2 + relu on
    # TR output rows of this tile.
    span = (TR - 1) * stride + 3
    row0 = pl.multiple_of(r * TR * stride, TR * stride)
    rows = pad_ref[:, pl.ds(row0, span), :, :]        # (nb, span, W+2, P) bf16

    def tap(dy, dx):
        if stride == 1:
            return rows[:, dy:dy + TR, dx:dx + Wout, :]
        return rows[:, dy:dy + (TR - 1) * stride + 1:stride,
                    dx:dx + (Wout - 1) * stride + 1:stride, :]

    M = nb * TR * Wout
    acc = jnp.zeros((M, P), jnp.float32)
    if P % 128 == 0:
        # Lane-aligned: concatenate the 3 dx taps -> one K=3P matmul per dy
        # (fills the 256-deep MXU on v6e/v7x for P >= 128).
        for dy in range(3):
            cat = jnp.concatenate([tap(dy, dx) for dx in range(3)], axis=-1)
            acc = acc + jnp.dot(cat.reshape(M, 3 * P), w2_ref[dy],
                                preferred_element_type=jnp.float32)
    else:
        # P not a multiple of 128: 9 separate K=P matmuls into the f32
        # accumulator (avoids misaligned lane concats / lane-offset slices).
        for dy in range(3):
            for dx in range(3):
                acc = acc + jnp.dot(tap(dy, dx).reshape(M, P),
                                    w2_ref[3 * dy + dx],
                                    preferred_element_type=jnp.float32)
    h2 = jnp.maximum(acc + b2_ref[...], 0.0)                     # f32 (M, P)

    # ---- Stage 2: conv3 (1x1) + bn3, shortcut (computed per tile, right
    # before the add -> no long-lived f32 sc), residual add, final ReLU.
    h3 = jnp.dot(h2.astype(jnp.bfloat16), w3_ref[...],
                 preferred_element_type=jnp.float32) + b3_ref[...]

    xr0 = pl.multiple_of(r * TR * stride, TR * stride)
    if stride == 1:
        x_tile = x_ref[:, pl.ds(xr0, TR), :, :].reshape(M, Cin)
    else:
        xs = x_ref[:, pl.ds(xr0, (TR - 1) * stride + 1), :, :]
        x_tile = xs[:, ::stride, ::stride, :].reshape(M, Cin)

    if use_projection:
        sc = (jnp.dot(x_tile, wsc_ref[...],
                      preferred_element_type=jnp.float32) + bsc_ref[...])
    else:
        sc = x_tile.astype(jnp.float32)          # identity: Cin == Cout

    out = jnp.maximum(h3 + sc, 0.0)
    out_ref[...] = out.reshape(nb, TR * Wout, Cout).astype(out_ref.dtype)


def _choose_tiles(N, Hout, Wout):
    """Row tile TR (divisor of Hout, >= ~128 output rows per step) and images
    per step nb (only batched when the whole image is already one small tile).
    Keeps per-step f32 intermediates + output blocks small on every generation
    (incl. v7x's 64 MiB VMEM) while amortizing per-grid-step overhead."""
    TR = Hout
    for t in range(1, Hout + 1):
        if Hout % t == 0 and t * Wout >= 128:
            TR = t
            break
    nb = 1
    if TR == Hout:
        for c in range(min(N, 8), 0, -1):
            if N % c == 0 and c * Hout * Wout <= 2048:
                nb = c
                break
    return nb, TR


def _vmem_limit_bytes(nb, H, W, Cin, P, Cout, TR, Wout):
    lanes = 128
    def cpad(c):
        return -(-c // lanes) * lanes
    x_blk = nb * H * W * cpad(Cin) * 2
    out_blk = nb * TR * Wout * cpad(Cout) * 2
    scr = nb * (H + 2) * (W + 2) * cpad(P) * 2
    live = nb * TR * Wout * (2 * cpad(P) + 2 * cpad(Cout)) * 4
    wts = (cpad(P) * (Cin + 9 * P + 1) + cpad(Cout) * (P + Cin + 1)) * 4
    est = 2 * (x_blk + out_blk) + scr + live + wts + (4 << 20)
    # Floor at 32 MiB for headroom; cap below v7x's 64 MiB physical VMEM.
    return int(min(max(est, 32 << 20), 48 << 20))


def bottleneck_forward_nhwc(x_nhwc, params, stride=1):
    """Block-to-block API: NHWC input -> NHWC bf16 output (no transposes)."""
    (w1, s1, b1, w2, s2, b2, w3, s3, b3, wsc, ssc, bsc) = params
    x = x_nhwc.astype(jnp.bfloat16)
    N, H, W, Cin = x.shape
    P = w1.shape[1]
    Cout = w3.shape[1]
    Hout = (H + 2 - 3) // stride + 1
    Wout = (W + 2 - 3) // stride + 1
    use_projection = (stride != 1) or (Cin != Cout)
    if use_projection:
        assert wsc is not None and ssc is not None and bsc is not None

    # Fold eval-mode BN scales into the (bf16, MXU-side) conv weights; biases
    # stay f32 for the VPU adds.
    w1f = (w1 * s1).astype(jnp.bfloat16)                         # (Cin, P)
    w3f = (w3 * s3).astype(jnp.bfloat16)                         # (P, Cout)
    w2f = w2 * s2.reshape(1, 1, 1, P)                            # (3,3,P,P) HWIO
    if P % 128 == 0:
        w2g = w2f.reshape(3, 3 * P, P).astype(jnp.bfloat16)      # per-dy K=3P
    else:
        w2g = w2f.reshape(9, P, P).astype(jnp.bfloat16)          # per-tap K=P
    b1f = b1.astype(jnp.float32)
    b2f = b2.astype(jnp.float32)
    b3f = b3.astype(jnp.float32)

    weight_args = [w1f, b1f, w2g, b2f, w3f, b3f]
    if use_projection:
        weight_args += [(wsc * ssc).astype(jnp.bfloat16),
                        bsc.astype(jnp.float32)]

    nb, TR = _choose_tiles(N, Hout, Wout)
    n_batch = N // nb
    n_row_tiles = Hout // TR
    grid = (n_batch, n_row_tiles)

    kern = partial(_bottleneck_kernel, stride, TR, use_projection)

    def rep_spec(arr):
        nd = arr.ndim
        return pl.BlockSpec(arr.shape, lambda n, r, _nd=nd: (0,) * _nd)

    in_specs = [pl.BlockSpec((nb, H, W, Cin), lambda n, r: (n, 0, 0, 0))]
    in_specs += [rep_spec(a) for a in weight_args]

    out = pl.pallas_call(
        kern,
        out_shape=jax.ShapeDtypeStruct((N, Hout * Wout, Cout), jnp.bfloat16),
        grid_spec=pltpu.PrefetchScalarGridSpec(
            num_scalar_prefetch=0,
            grid=grid,
            in_specs=in_specs,
            out_specs=pl.BlockSpec((nb, TR * Wout, Cout),
                                   lambda n, r: (n, r, 0)),
            scratch_shapes=[pltpu.VMEM((nb, H + 2, W + 2, P), jnp.bfloat16)],
        ),
        compiler_params=pltpu.CompilerParams(
            dimension_semantics=("parallel", "arbitrary"),
            vmem_limit_bytes=_vmem_limit_bytes(nb, H, W, Cin, P, Cout,
                                               TR, Wout)),
    )(x, *weight_args)

    return out.reshape(N, Hout, Wout, Cout)


def bottleneck_forward(x_nchw, params, stride=1):
    """PyTorch-layout wrapper: NCHW f32 in/out (network-boundary conversion)."""
    x = jnp.transpose(x_nchw, (0, 2, 3, 1))                       # NCHW -> NHWC
    out = bottleneck_forward_nhwc(x, params, stride=stride)
    return jnp.transpose(out, (0, 3, 1, 2)).astype(jnp.float32)   # NHWC -> NCHW


def init_params(key, in_planes, planes, stride=1):
    cout = EXPANSION * planes
    use_projection = (stride != 1) or (in_planes != cout)
    ks = jax.random.split(key, 20)

    def conv_w(k, shape, fan_in):
        return jax.random.normal(k, shape, jnp.float32) / jnp.sqrt(float(fan_in))

    w1 = conv_w(ks[0], (in_planes, planes), in_planes)             # 1x1 conv1
    w2 = conv_w(ks[1], (3, 3, planes, planes), 9 * planes)         # 3x3 conv2
    w3 = conv_w(ks[2], (planes, cout), planes)                     # 1x1 conv3

    def bn(kg, kb, km, kv, c):
        gamma = 1.0 + 0.1 * jax.random.normal(kg, (c,), jnp.float32)
        beta = 0.1 * jax.random.normal(kb, (c,), jnp.float32)
        mean = 0.1 * jax.random.normal(km, (c,), jnp.float32)
        var = 1.0 + 0.1 * jax.random.uniform(kv, (c,), jnp.float32)
        scale = gamma / jnp.sqrt(var + BN_EPS)
        bias = beta - mean * scale
        return scale.reshape(1, c), bias.reshape(1, c)

    s1, b1 = bn(ks[4], ks[5], ks[6], ks[7], planes)
    s2, b2 = bn(ks[8], ks[9], ks[10], ks[11], planes)
    s3, b3 = bn(ks[12], ks[13], ks[14], ks[15], cout)
    if use_projection:
        wsc = conv_w(ks[3], (in_planes, cout), in_planes)          # 1x1 shortcut
        ssc, bsc = bn(ks[16], ks[17], ks[18], ks[19], cout)
    else:
        wsc = ssc = bsc = None
    return (w1, s1, b1, w2, s2, b2, w3, s3, b3, wsc, ssc, bsc)


def ref_forward(x_nchw, params, stride=1):
    """Pure-JAX f32 reference (same eval-mode BN folding) for validation."""
    (w1, s1, b1, w2, s2, b2, w3, s3, b3, wsc, ssc, bsc) = params
    x = jnp.transpose(x_nchw, (0, 2, 3, 1)).astype(jnp.float32)
    h1 = jnp.maximum(jnp.einsum('nhwc,cd->nhwd', x, w1) * s1 + b1, 0.0)
    h2 = lax.conv_general_dilated(h1, w2, (stride, stride), ((1, 1), (1, 1)),
                                  dimension_numbers=('NHWC', 'HWIO', 'NHWC'))
    h2 = jnp.maximum(h2 * s2 + b2, 0.0)
    h3 = jnp.einsum('nhwc,cd->nhwd', h2, w3) * s3 + b3
    if wsc is not None:
        xs = x[:, ::stride, ::stride, :]
        sc = jnp.einsum('nhwc,cd->nhwd', xs, wsc) * ssc + bsc
    else:
        sc = x
    out = jnp.maximum(h3 + sc, 0.0)
    return jnp.transpose(out, (0, 3, 1, 2))


if __name__ == "__main__":
    key = jax.random.PRNGKey(0)
    k1, k2, k3, k4 = jax.random.split(key, 4)

    # Case 1: projection shortcut (in_planes != 4*planes), stride=1.
    in_planes, planes = 4, 4
    x1 = jax.random.normal(k1, (2, in_planes, 16, 16), jnp.float32)   # NCHW
    p1 = init_params(k2, in_planes, planes, stride=1)
    out1 = jax.block_until_ready(bottleneck_forward(x1, p1, stride=1))
    ref1 = ref_forward(x1, p1, stride=1)
    assert out1.shape == (2, EXPANSION * planes, 16, 16), out1.shape
    err1 = float(jnp.max(jnp.abs(out1 - ref1)))
    assert jnp.allclose(out1, ref1, rtol=1e-1, atol=1e-1), err1

    # Case 2: identity shortcut (in_planes == 4*planes), stride=1.
    in_planes, planes = 16, 4
    x2 = jax.random.normal(k3, (2, in_planes, 16, 16), jnp.float32)   # NCHW
    p2 = init_params(k4, in_planes, planes, stride=1)
    out2 = jax.block_until_ready(bottleneck_forward(x2, p2, stride=1))
    ref2 = ref_forward(x2, p2, stride=1)
    assert out2.shape == (2, EXPANSION * planes, 16, 16), out2.shape
    err2 = float(jnp.max(jnp.abs(out2 - ref2)))
    assert jnp.allclose(out2, ref2, rtol=1e-1, atol=1e-1), err2

    print("KERNEL_OK")
</pallas_src>

<mosaic_0001>
module attributes {stable_mosaic.version = 11 : i64} {
  func.func @_bottleneck_kernel(%arg0: i32, %arg1: i32, %arg2: memref<1x16x16x4xbf16, #tpu.memory_space<vmem>>, %arg3: memref<4x4xbf16, #tpu.memory_space<vmem>>, %arg4: memref<1x4xf32, #tpu.memory_space<vmem>>, %arg5: memref<9x4x4xbf16, #tpu.memory_space<vmem>>, %arg6: memref<1x4xf32, #tpu.memory_space<vmem>>, %arg7: memref<4x16xbf16, #tpu.memory_space<vmem>>, %arg8: memref<1x16xf32, #tpu.memory_space<vmem>>, %arg9: memref<4x16xbf16, #tpu.memory_space<vmem>>, %arg10: memref<1x16xf32, #tpu.memory_space<vmem>>, %arg11: memref<1x128x16xbf16, #tpu.memory_space<vmem>>, %arg12: memref<1x18x18x4xbf16, #tpu.memory_space<vmem>>) attributes {dimension_semantics = [#tpu.dimension_semantics<parallel>, #tpu.dimension_semantics<arbitrary>], iteration_bounds = array<i64: 2, 2>, scalar_prefetch = 0 : i64, scratch_operands = 1 : i64, tpu.core_type = #tpu.core_type<tc>, window_params = [{transform_indices = @transform_0, window_bounds = array<i64: 1, 16, 16, 4>}, {pipeline_mode = #tpu.pipeline_mode<synchronous>, transform_indices = @transform_1, window_bounds = array<i64: 4, 4>}, {pipeline_mode = #tpu.pipeline_mode<synchronous>, transform_indices = @transform_2, window_bounds = array<i64: 1, 4>}, {pipeline_mode = #tpu.pipeline_mode<synchronous>, transform_indices = @transform_3, window_bounds = array<i64: 9, 4, 4>}, {pipeline_mode = #tpu.pipeline_mode<synchronous>, transform_indices = @transform_4, window_bounds = array<i64: 1, 4>}, {pipeline_mode = #tpu.pipeline_mode<synchronous>, transform_indices = @transform_5, window_bounds = array<i64: 4, 16>}, {pipeline_mode = #tpu.pipeline_mode<synchronous>, transform_indices = @transform_6, window_bounds = array<i64: 1, 16>}, {pipeline_mode = #tpu.pipeline_mode<synchronous>, transform_indices = @transform_7, window_bounds = array<i64: 4, 16>}, {pipeline_mode = #tpu.pipeline_mode<synchronous>, transform_indices = @transform_8, window_bounds = array<i64: 1, 16>}, {transform_indices = @transform_9, window_bounds = array<i64: 1, 128, 16>}]} {
    %c0_i32 = arith.constant 0 : i32
    %0 = arith.cmpi eq, %arg1, %c0_i32 : i32
    %1 = arith.extui %0 : i1 to i32
    %c0_i32_0 = arith.constant 0 : i32
    %2 = arith.cmpi ne, %1, %c0_i32_0 : i32
    scf.if %2 {
      %cst_53 = arith.constant 0.000000e+00 : bf16
      %91 = vector.broadcast %cst_53 : bf16 to vector<1x1x18x4xbf16>
      %c0_54 = arith.constant 0 : index
      %c0_55 = arith.constant 0 : index
      %c0_56 = arith.constant 0 : index
      %c0_57 = arith.constant 0 : index
      %92 = vector.load %arg12[%c0_54, %c0_55, %c0_56, %c0_57] : memref<1x18x18x4xbf16, #tpu.memory_space<vmem>>, vector<1x1x18x4xbf16>
      tpu.vector_store %arg12[%c0_54, %c0_55, %c0_56, %c0_57], %91 {strides = array<i32>} : memref<1x18x18x4xbf16, #tpu.memory_space<vmem>>, vector<1x1x18x4xbf16>,
      %cst_58 = arith.constant 0.000000e+00 : bf16
      %93 = vector.broadcast %cst_58 : bf16 to vector<1x1x18x4xbf16>
      %c0_59 = arith.constant 0 : index
      %c17 = arith.constant 17 : index
      %c0_60 = arith.constant 0 : index
      %c0_61 = arith.constant 0 : index
      %94 = vector.load %arg12[%c0_59, %c17, %c0_60, %c0_61] : memref<1x18x18x4xbf16, #tpu.memory_space<vmem>>, vector<1x1x18x4xbf16>
      tpu.vector_store %arg12[%c0_59, %c17, %c0_60, %c0_61], %93 {strides = array<i32>} : memref<1x18x18x4xbf16, #tpu.memory_space<vmem>>, vector<1x1x18x4xbf16>,
      %cst_62 = arith.constant 0.000000e+00 : bf16
      %95 = vector.broadcast %cst_62 : bf16 to vector<1x18x1x4xbf16>
      %c0_63 = arith.constant 0 : index
      %c0_64 = arith.constant 0 : index
      %c0_65 = arith.constant 0 : index
      %c0_66 = arith.constant 0 : index
      %96 = vector.load %arg12[%c0_63, %c0_64, %c0_65, %c0_66] : memref<1x18x18x4xbf16, #tpu.memory_space<vmem>>, vector<1x18x1x4xbf16>
      tpu.vector_store %arg12[%c0_63, %c0_64, %c0_65, %c0_66], %95 {strides = array<i32>} : memref<1x18x18x4xbf16, #tpu.memory_space<vmem>>, vector<1x18x1x4xbf16>,
      %cst_67 = arith.constant 0.000000e+00 : bf16
      %97 = vector.broadcast %cst_67 : bf16 to vector<1x18x1x4xbf16>
      %c0_68 = arith.constant 0 : index
      %c0_69 = arith.constant 0 : index
      %c17_70 = arith.constant 17 : index
      %c0_71 = arith.constant 0 : index
      %98 = vector.load %arg12[%c0_68, %c0_69, %c17_70, %c0_71] : memref<1x18x18x4xbf16, #tpu.memory_space<vmem>>, vector<1x18x1x4xbf16>
      tpu.vector_store %arg12[%c0_68, %c0_69, %c17_70, %c0_71], %97 {strides = array<i32>} : memref<1x18x18x4xbf16, #tpu.memory_space<vmem>>, vector<1x18x1x4xbf16>,
      %c0_72 = arith.constant 0 : index
      %c0_73 = arith.constant 0 : index
      %c0_74 = arith.constant 0 : index
      %c0_75 = arith.constant 0 : index
      %99 = vector.load %arg2[%c0_72, %c0_73, %c0_74, %c0_75] : memref<1x16x16x4xbf16, #tpu.memory_space<vmem>>, vector<1x16x16x4xbf16>
      %100 = vector.shape_cast %99 : vector<1x16x16x4xbf16> to vector<256x4xbf16>
      %c0_76 = arith.constant 0 : index
      %c0_77 = arith.constant 0 : index
      %101 = vector.load %arg3[%c0_76, %c0_77] : memref<4x4xbf16, #tpu.memory_space<vmem>>, vector<4x4xbf16>
      %cst_78 = arith.constant dense<0.000000e+00> : vector<256x4xf32>
      %102 = tpu.matmul %100, %101, %cst_78 {dimension_numbers = #tpu.dot_dimension_numbers<[1], [0], [0], [1], [0, 0, 1, 1], [], []>} : vector<256x4xbf16>, vector<4x4xbf16>, vector<256x4xf32> -> vector<256x4xf32>
      %c0_79 = arith.constant 0 : index
      %c0_80 = arith.constant 0 : index
      %103 = vector.load %arg4[%c0_79, %c0_80] : memref<1x4xf32, #tpu.memory_space<vmem>>, vector<1x4xf32>
      %104 = vector.broadcast %103 : vector<1x4xf32> to vector<256x4xf32>
      %105 = arith.addf %102, %104 : vector<256x4xf32>
      %cst_81 = arith.constant 0.000000e+00 : f32
      %106 = vector.broadcast %cst_81 : f32 to vector<256x4xf32>
      %107 = arith.maximumf %105, %106 : vector<256x4xf32>
      %108 = arith.truncf %107 : vector<256x4xf32> to vector<256x4xbf16>
      %109 = vector.shape_cast %108 : vector<256x4xbf16> to vector<1x16x16x4xbf16>
      %c0_82 = arith.constant 0 : index
      %c1_83 = arith.constant 1 : index
      %c1_84 = arith.constant 1 : index
      %c0_85 = arith.constant 0 : index
      %110 = vector.load %arg12[%c0_82, %c1_83, %c1_84, %c0_85] : memref<1x18x18x4xbf16, #tpu.memory_space<vmem>>, vector<1x16x16x4xbf16>
      tpu.vector_store %arg12[%c0_82, %c1_83, %c1_84, %c0_85], %109 {strides = array<i32>} : memref<1x18x18x4xbf16, #tpu.memory_space<vmem>>, vector<1x16x16x4xbf16>,
    } else {
    }
    %c8_i32 = arith.constant 8 : i32
    %3 = arith.muli %arg1, %c8_i32 : i32
    %c1_i32 = arith.constant 1 : i32
    %4 = arith.muli %3, %c1_i32 : i32
    %5 = tpu.assume_multiple %4, 8 : i32
    %c0 = arith.constant 0 : index
    %6 = arith.index_cast %5 : i32 to index
    %c0_1 = arith.constant 0 : index
    %c0_2 = arith.constant 0 : index
    %7 = vector.load %arg12[%c0, %6, %c0_1, %c0_2] : memref<1x18x18x4xbf16, #tpu.memory_space<vmem>>, vector<1x10x18x4xbf16>
    %cst = arith.constant 0.000000e+00 : f32
    %8 = vector.broadcast %cst : f32 to vector<128x4xf32>
    %9 = vector.extract_strided_slice %7 {offsets = [0, 0, 0, 0], sizes = [1, 8, 16, 4], strides = [1, 1, 1, 1]} : vector<1x10x18x4xbf16> to vector<1x8x16x4xbf16>
    %10 = vector.shape_cast %9 : vector<1x8x16x4xbf16> to vector<128x4xbf16>
    %c0_3 = arith.constant 0 : index
    %c0_4 = arith.constant 0 : index
    %c0_5 = arith.constant 0 : index
    %11 = vector.load %arg5[%c0_3, %c0_4, %c0_5] : memref<9x4x4xbf16, #tpu.memory_space<vmem>>, vector<1x4x4xbf16>
    %12 = vector.shape_cast %11 : vector<1x4x4xbf16> to vector<4x4xbf16>
    %cst_6 = arith.constant dense<0.000000e+00> : vector<128x4xf32>
    %13 = tpu.matmul %10, %12, %cst_6 {dimension_numbers = #tpu.dot_dimension_numbers<[1], [0], [0], [1], [0, 0, 1, 1], [], []>} : vector<128x4xbf16>, vector<4x4xbf16>, vector<128x4xf32> -> vector<128x4xf32>
    %14 = arith.addf %8, %13 : vector<128x4xf32>
    %15 = vector.extract_strided_slice %7 {offsets = [0, 0, 1, 0], sizes = [1, 8, 16, 4], strides = [1, 1, 1, 1]} : vector<1x10x18x4xbf16> to vector<1x8x16x4xbf16>
    %16 = vector.shape_cast %15 : vector<1x8x16x4xbf16> to vector<128x4xbf16>
    %c1 = arith.constant 1 : index
    %c0_7 = arith.constant 0 : index
    %c0_8 = arith.constant 0 : index
    %17 = vector.load %arg5[%c1, %c0_7, %c0_8] : memref<9x4x4xbf16, #tpu.memory_space<vmem>>, vector<1x4x4xbf16>
    %18 = vector.shape_cast %17 : vector<1x4x4xbf16> to vector<4x4xbf16>
    %cst_9 = arith.constant dense<0.000000e+00> : vector<128x4xf32>
    %19 = tpu.matmul %16, %18, %cst_9 {dimension_numbers = #tpu.dot_dimension_numbers<[1], [0], [0], [1], [0, 0, 1, 1], [], []>} : vector<128x4xbf16>, vector<4x4xbf16>, vector<128x4xf32> -> vector<128x4xf32>
    %20 = arith.addf %14, %19 : vector<128x4xf32>
    %21 = vector.extract_strided_slice %7 {offsets = [0, 0, 2, 0], sizes = [1, 8, 16, 4], strides = [1, 1, 1, 1]} : vector<1x10x18x4xbf16> to vector<1x8x16x4xbf16>
    %22 = vector.shape_cast %21 : vector<1x8x16x4xbf16> to vector<128x4xbf16>
    %c2 = arith.constant 2 : index
    %c0_10 = arith.constant 0 : index
    %c0_11 = arith.constant 0 : index
    %23 = vector.load %arg5[%c2, %c0_10, %c0_11] : memref<9x4x4xbf16, #tpu.memory_space<vmem>>, vector<1x4x4xbf16>
    %24 = vector.shape_cast %23 : vector<1x4x4xbf16> to vector<4x4xbf16>
    %cst_12 = arith.constant dense<0.000000e+00> : vector<128x4xf32>
    %25 = tpu.matmul %22, %24, %cst_12 {dimension_numbers = #tpu.dot_dimension_numbers<[1], [0], [0], [1], [0, 0, 1, 1], [], []>} : vector<128x4xbf16>, vector<4x4xbf16>, vector<128x4xf32> -> vector<128x4xf32>
    %26 = arith.addf %20, %25 : vector<128x4xf32>
    %27 = vector.extract_strided_slice %7 {offsets = [0, 1, 0, 0], sizes = [1, 8, 16, 4], strides = [1, 1, 1, 1]} : vector<1x10x18x4xbf16> to vector<1x8x16x4xbf16>
    %28 = vector.shape_cast %27 : vector<1x8x16x4xbf16> to vector<128x4xbf16>
    %c3 = arith.constant 3 : index
    %c0_13 = arith.constant 0 : index
    %c0_14 = arith.constant 0 : index
    %29 = vector.load %arg5[%c3, %c0_13, %c0_14] : memref<9x4x4xbf16, #tpu.memory_space<vmem>>, vector<1x4x4xbf16>
    %30 = vector.shape_cast %29 : vector<1x4x4xbf16> to vector<4x4xbf16>
    %cst_15 = arith.constant dense<0.000000e+00> : vector<128x4xf32>
    %31 = tpu.matmul %28, %30, %cst_15 {dimension_numbers = #tpu.dot_dimension_numbers<[1], [0], [0], [1], [0, 0, 1, 1], [], []>} : vector<128x4xbf16>, vector<4x4xbf16>, vector<128x4xf32> -> vector<128x4xf32>
    %32 = arith.addf %26, %31 : vector<128x4xf32>
    %33 = vector.extract_strided_slice %7 {offsets = [0, 1, 1, 0], sizes = [1, 8, 16, 4], strides = [1, 1, 1, 1]} : vector<1x10x18x4xbf16> to vector<1x8x16x4xbf16>
    %34 = vector.shape_cast %33 : vector<1x8x16x4xbf16> to vector<128x4xbf16>
    %c4 = arith.constant 4 : index
    %c0_16 = arith.constant 0 : index
    %c0_17 = arith.constant 0 : index
    %35 = vector.load %arg5[%c4, %c0_16, %c0_17] : memref<9x4x4xbf16, #tpu.memory_space<vmem>>, vector<1x4x4xbf16>
    %36 = vector.shape_cast %35 : vector<1x4x4xbf16> to vector<4x4xbf16>
    %cst_18 = arith.constant dense<0.000000e+00> : vector<128x4xf32>
    %37 = tpu.matmul %34, %36, %cst_18 {dimension_numbers = #tpu.dot_dimension_numbers<[1], [0], [0], [1], [0, 0, 1, 1], [], []>} : vector<128x4xbf16>, vector<4x4xbf16>, vector<128x4xf32> -> vector<128x4xf32>
    %38 = arith.addf %32, %37 : vector<128x4xf32>
    %39 = vector.extract_strided_slice %7 {offsets = [0, 1, 2, 0], sizes = [1, 8, 16, 4], strides = [1, 1, 1, 1]} : vector<1x10x18x4xbf16> to vector<1x8x16x4xbf16>
    %40 = vector.shape_cast %39 : vector<1x8x16x4xbf16> to vector<128x4xbf16>
    %c5 = arith.constant 5 : index
    %c0_19 = arith.constant 0 : index
    %c0_20 = arith.constant 0 : index
    %41 = vector.load %arg5[%c5, %c0_19, %c0_20] : memref<9x4x4xbf16, #tpu.memory_space<vmem>>, vector<1x4x4xbf16>
    %42 = vector.shape_cast %41 : vector<1x4x4xbf16> to vector<4x4xbf16>
    %cst_21 = arith.constant dense<0.000000e+00> : vector<128x4xf32>
    %43 = tpu.matmul %40, %42, %cst_21 {dimension_numbers = #tpu.dot_dimension_numbers<[1], [0], [0], [1], [0, 0, 1, 1], [], []>} : vector<128x4xbf16>, vector<4x4xbf16>, vector<128x4xf32> -> vector<128x4xf32>
    %44 = arith.addf %38, %43 : vector<128x4xf32>
    %45 = vector.extract_strided_slice %7 {offsets = [0, 2, 0, 0], sizes = [1, 8, 16, 4], strides = [1, 1, 1, 1]} : vector<1x10x18x4xbf16> to vector<1x8x16x4xbf16>
    %46 = vector.shape_cast %45 : vector<1x8x16x4xbf16> to vector<128x4xbf16>
    %c6 = arith.constant 6 : index
    %c0_22 = arith.constant 0 : index
    %c0_23 = arith.constant 0 : index
    %47 = vector.load %arg5[%c6, %c0_22, %c0_23] : memref<9x4x4xbf16, #tpu.memory_space<vmem>>, vector<1x4x4xbf16>
    %48 = vector.shape_cast %47 : vector<1x4x4xbf16> to vector<4x4xbf16>
    %cst_24 = arith.constant dense<0.000000e+00> : vector<128x4xf32>
    %49 = tpu.matmul %46, %48, %cst_24 {dimension_numbers = #tpu.dot_dimension_numbers<[1], [0], [0], [1], [0, 0, 1, 1], [], []>} : vector<128x4xbf16>, vector<4x4xbf16>, vector<128x4xf32> -> vector<128x4xf32>
    %50 = arith.addf %44, %49 : vector<128x4xf32>
    %51 = vector.extract_strided_slice %7 {offsets = [0, 2, 1, 0], sizes = [1, 8, 16, 4], strides = [1, 1, 1, 1]} : vector<1x10x18x4xbf16> to vector<1x8x16x4xbf16>
    %52 = vector.shape_cast %51 : vector<1x8x16x4xbf16> to vector<128x4xbf16>
    %c7 = arith.constant 7 : index
    %c0_25 = arith.constant 0 : index
    %c0_26 = arith.constant 0 : index
    %53 = vector.load %arg5[%c7, %c0_25, %c0_26] : memref<9x4x4xbf16, #tpu.memory_space<vmem>>, vector<1x4x4xbf16>
    %54 = vector.shape_cast %53 : vector<1x4x4xbf16> to vector<4x4xbf16>
    %cst_27 = arith.constant dense<0.000000e+00> : vector<128x4xf32>
    %55 = tpu.matmul %52, %54, %cst_27 {dimension_numbers = #tpu.dot_dimension_numbers<[1], [0], [0], [1], [0, 0, 1, 1], [], []>} : vector<128x4xbf16>, vector<4x4xbf16>, vector<128x4xf32> -> vector<128x4xf32>
    %56 = arith.addf %50, %55 : vector<128x4xf32>
    %57 = vector.extract_strided_slice %7 {offsets = [0, 2, 2, 0], sizes = [1, 8, 16, 4], strides = [1, 1, 1, 1]} : vector<1x10x18x4xbf16> to vector<1x8x16x4xbf16>
    %58 = vector.shape_cast %57 : vector<1x8x16x4xbf16> to vector<128x4xbf16>
    %c8 = arith.constant 8 : index
    %c0_28 = arith.constant 0 : index
    %c0_29 = arith.constant 0 : index
    %59 = vector.load %arg5[%c8, %c0_28, %c0_29] : memref<9x4x4xbf16, #tpu.memory_space<vmem>>, vector<1x4x4xbf16>
    %60 = vector.shape_cast %59 : vector<1x4x4xbf16> to vector<4x4xbf16>
    %cst_30 = arith.constant dense<0.000000e+00> : vector<128x4xf32>
    %61 = tpu.matmul %58, %60, %cst_30 {dimension_numbers = #tpu.dot_dimension_numbers<[1], [0], [0], [1], [0, 0, 1, 1], [], []>} : vector<128x4xbf16>, vector<4x4xbf16>, vector<128x4xf32> -> vector<128x4xf32>
    %62 = arith.addf %56, %61 : vector<128x4xf32>
    %c0_31 = arith.constant 0 : index
    %c0_32 = arith.constant 0 : index
    %63 = vector.load %arg6[%c0_31, %c0_32] : memref<1x4xf32, #tpu.memory_space<vmem>>, vector<1x4xf32>
    %64 = vector.broadcast %63 : vector<1x4xf32> to vector<128x4xf32>
    %65 = arith.addf %62, %64 : vector<128x4xf32>
    %cst_33 = arith.constant 0.000000e+00 : f32
    %66 = vector.broadcast %cst_33 : f32 to vector<128x4xf32>
    %67 = arith.maximumf %65, %66 : vector<128x4xf32>
    %68 = arith.truncf %67 : vector<128x4xf32> to vector<128x4xbf16>
    %c0_34 = arith.constant 0 : index
    %c0_35 = arith.constant 0 : index
    %69 = vector.load %arg7[%c0_34, %c0_35] : memref<4x16xbf16, #tpu.memory_space<vmem>>, vector<4x16xbf16>
    %cst_36 = arith.constant dense<0.000000e+00> : vector<128x16xf32>
    %70 = tpu.matmul %68, %69, %cst_36 {dimension_numbers = #tpu.dot_dimension_numbers<[1], [0], [0], [1], [0, 0, 1, 1], [], []>} : vector<128x4xbf16>, vector<4x16xbf16>, vector<128x16xf32> -> vector<128x16xf32>
    %c0_37 = arith.constant 0 : index
    %c0_38 = arith.constant 0 : index
    %71 = vector.load %arg8[%c0_37, %c0_38] : memref<1x16xf32, #tpu.memory_space<vmem>>, vector<1x16xf32>
    %72 = vector.broadcast %71 : vector<1x16xf32> to vector<128x16xf32>
    %73 = arith.addf %70, %72 : vector<128x16xf32>
    %c8_i32_39 = arith.constant 8 : i32
    %74 = arith.muli %arg1, %c8_i32_39 : i32
    %c1_i32_40 = arith.constant 1 : i32
    %75 = arith.muli %74, %c1_i32_40 : i32
    %76 = tpu.assume_multiple %75, 8 : i32
    %c0_41 = arith.constant 0 : index
    %77 = arith.index_cast %76 : i32 to index
    %c0_42 = arith.constant 0 : index
    %c0_43 = arith.constant 0 : index
    %78 = vector.load %arg2[%c0_41, %77, %c0_42, %c0_43] : memref<1x16x16x4xbf16, #tpu.memory_space<vmem>>, vector<1x8x16x4xbf16>
    %79 = vector.shape_cast %78 : vector<1x8x16x4xbf16> to vector<128x4xbf16>
    %c0_44 = arith.constant 0 : index
    %c0_45 = arith.constant 0 : index
    %80 = vector.load %arg9[%c0_44, %c0_45] : memref<4x16xbf16, #tpu.memory_space<vmem>>, vector<4x16xbf16>
    %cst_46 = arith.constant dense<0.000000e+00> : vector<128x16xf32>
    %81 = tpu.matmul %79, %80, %cst_46 {dimension_numbers = #tpu.dot_dimension_numbers<[1], [0], [0], [1], [0, 0, 1, 1], [], []>} : vector<128x4xbf16>, vector<4x16xbf16>, vector<128x16xf32> -> vector<128x16xf32>
    %c0_47 = arith.constant 0 : index
    %c0_48 = arith.constant 0 : index
    %82 = vector.load %arg10[%c0_47, %c0_48] : memref<1x16xf32, #tpu.memory_space<vmem>>, vector<1x16xf32>
    %83 = vector.broadcast %82 : vector<1x16xf32> to vector<128x16xf32>
    %84 = arith.addf %81, %83 : vector<128x16xf32>
    %85 = arith.addf %73, %84 : vector<128x16xf32>
    %cst_49 = arith.constant 0.000000e+00 : f32
    %86 = vector.broadcast %cst_49 : f32 to vector<128x16xf32>
    %87 = arith.maximumf %85, %86 : vector<128x16xf32>
    %88 = vector.shape_cast %87 : vector<128x16xf32> to vector<1x128x16xf32>
    %89 = arith.truncf %88 : vector<1x128x16xf32> to vector<1x128x16xbf16>
    %c0_50 = arith.constant 0 : index
    %c0_51 = arith.constant 0 : index
    %c0_52 = arith.constant 0 : index
    %90 = vector.load %arg11[%c0_50, %c0_51, %c0_52] : memref<1x128x16xbf16, #tpu.memory_space<vmem>>, vector<1x128x16xbf16>
    tpu.vector_store %arg11[%c0_50, %c0_51, %c0_52], %89 {strides = array<i32>} : memref<1x128x16xbf16, #tpu.memory_space<vmem>>, vector<1x128x16xbf16>,
    return
  }
  func.func @transform_0(%arg0: i32, %arg1: i32) -> (i32, i32, i32, i32) {
    %c0_i32 = arith.constant 0 : i32
    %c0_i32_0 = arith.constant 0 : i32
    %c0_i32_1 = arith.constant 0 : i32
    %c0_i32_2 = arith.constant 0 : i32
    return %arg0, %c0_i32, %c0_i32_0, %c0_i32_1 : i32, i32, i32, i32
  }
  func.func @transform_1(%arg0: i32, %arg1: i32) -> (i32, i32) {
    %c0_i32 = arith.constant 0 : i32
    %c0_i32_0 = arith.constant 0 : i32
    %c0_i32_1 = arith.constant 0 : i32
    return %c0_i32, %c0_i32_0 : i32, i32
  }
  func.func @transform_2(%arg0: i32, %arg1: i32) -> (i32, i32) {
    %c0_i32 = arith.constant 0 : i32
    %c0_i32_0 = arith.constant 0 : i32
    %c0_i32_1 = arith.constant 0 : i32
    return %c0_i32, %c0_i32_0 : i32, i32
  }
  func.func @transform_3(%arg0: i32, %arg1: i32) -> (i32, i32, i32) {
    %c0_i32 = arith.constant 0 : i32
    %c0_i32_0 = arith.constant 0 : i32
    %c0_i32_1 = arith.constant 0 : i32
    %c0_i32_2 = arith.constant 0 : i32
    return %c0_i32, %c0_i32_0, %c0_i32_1 : i32, i32, i32
  }
  func.func @transform_4(%arg0: i32, %arg1: i32) -> (i32, i32) {
    %c0_i32 = arith.constant 0 : i32
    %c0_i32_0 = arith.constant 0 : i32
    %c0_i32_1 = arith.constant 0 : i32
    return %c0_i32, %c0_i32_0 : i32, i32
  }
  func.func @transform_5(%arg0: i32, %arg1: i32) -> (i32, i32) {
    %c0_i32 = arith.constant 0 : i32
    %c0_i32_0 = arith.constant 0 : i32
    %c0_i32_1 = arith.constant 0 : i32
    return %c0_i32, %c0_i32_0 : i32, i32
  }
  func.func @transform_6(%arg0: i32, %arg1: i32) -> (i32, i32) {
    %c0_i32 = arith.constant 0 : i32
    %c0_i32_0 = arith.constant 0 : i32
    %c0_i32_1 = arith.constant 0 : i32
    return %c0_i32, %c0_i32_0 : i32, i32
  }
  func.func @transform_7(%arg0: i32, %arg1: i32) -> (i32, i32) {
    %c0_i32 = arith.constant 0 : i32
    %c0_i32_0 = arith.constant 0 : i32
    %c0_i32_1 = arith.constant 0 : i32
    return %c0_i32, %c0_i32_0 : i32, i32
  }
  func.func @transform_8(%arg0: i32, %arg1: i32) -> (i32, i32) {
    %c0_i32 = arith.constant 0 : i32
    %c0_i32_0 = arith.constant 0 : i32
    %c0_i32_1 = arith.constant 0 : i32
    return %c0_i32, %c0_i32_0 : i32, i32
  }
  func.func @transform_9(%arg0: i32, %arg1: i32) -> (i32, i32, i32) {
    %c0_i32 = arith.constant 0 : i32
    %c0_i32_0 = arith.constant 0 : i32
    return %arg0, %arg1, %c0_i32 : i32, i32, i32
  }
}

</mosaic_0001>

<bundles_post_ra>
// kernel: tpu_custom_call.1
= control target key start
LH: loop header
LB: loop body
LE: loop exit
PB: predicated region body
PF: predicated region fallthrough
CT: control target
= control target key end

     0   :  { %s4374_s30 = smov 0   ;;  %s4376_s10 = smov 0   ;;  %s5637_s0 = inlined_call_operand.vmem [shape: bf16[2,16,16,4], index: 0, kind: input, shape index: {}]   ;;  %s5638_s1 = inlined_call_operand.vmem [shape: bf16[4,4], index: 1, kind: input, shape index: {}]   ;;  %s5639_s2 = inlined_call_operand.vmem [shape: f32[1,4], index: 2, kind: input, shape index: {}]   ;;  %s5640_s3 = inlined_call_operand.vmem [shape: bf16[9,4,4], index: 3, kind: input, shape index: {}]   ;;  %s5641_s4 = inlined_call_operand.vmem [shape: f32[1,4], index: 4, kind: input, shape index: {}]   ;;  %s5642_s5 = inlined_call_operand.vmem [shape: bf16[4,16], index: 5, kind: input, shape index: {}]   ;;  %s5643_s6 = inlined_call_operand.vmem [shape: f32[1,16], index: 6, kind: input, shape index: {}]   ;;  %s5644_s7 = inlined_call_operand.vmem [shape: bf16[4,16], index: 7, kind: input, shape index: {}]   ;;  %s5645_s8 = inlined_call_operand.vmem [shape: f32[1,16], index: 8, kind: input, shape index: {}]   ;;  %s5646_s9 = inlined_call_operand.vmem [shape: bf16[2,256,16], index: 9, kind: output, shape index: {}]  }
   0x1   :  { %s4378_s11 = smov 0   ;;  %s4380_s12 = smov 0  }
   0x2   :  { %s4382_s13 = smov 0  }
   0x3 LB: > { %s28_s14 = sadd.s32 1, %s4313_s11  ;;  %s31_s15 = sadd.s32 1, %s4317_s12  ;;  %s4321_s13 = sphi %s4382_s13, %s19_s13   ;;  %s4317_s12 = sphi %s4380_s12, %s5698_s12   ;;  %s4313_s11 = sphi %s4378_s11, %s5697_s11   ;;  %s4309_s10 = sphi %s4376_s10, %s5696_s10   ;;  %s4305_s30 = sphi %s4374_s30, %s5695_s30  }
   0x4   : > { %p29_p0 = scmp.ge.s32.totalorder %s28_s14, 2  ;;  %p3548_p1 = scmp.ge.s32.totalorder %s4321_s13, 1 }
   0x5   : > { %p301_p2 = scmp.lt.s32.totalorder %s4321_s13, 5 }
   0x6   : > { %s5700_s14 = smov (%p29_p0, %s28_s14), 0  ;;  %s5702_s15 = smov (!%p29_p0, %s31_s15), %s4317_s12 }
   0x7   : > { %p302_p3 = pnand %p3548_p1, %p301_p2  ;;  %p33_p4 = scmp.ge.s32.totalorder %s5702_s15, 2 }
   0x9   : > { %s5704_s15 = smov (%p33_p4, %s5702_s15), 0  ;;  %305 = sbr.rel (%p302_p3) target bundleno = 901 (0x385), region = 56 }
   0xe   : > { %p341_p5 = scmp.lt.s32.totalorder %s4309_s10, 1  ;;  %s3551_s16 = sshll.u32 %s4305_s30, 4 }
   0xf   : > { %p349_p6 = scmp.lt.s32.totalorder %s3551_s16, 31  ;;  %p3554_p7 = scmp.ne.s32.totalorder %s4305_s30, 0 }
  0x10   : > { %s5706_s10 = smov (!%p341_p5, %s4309_s10), 1 }
  0x11   : > { %s5708_s16 = smov (!%p349_p6, %s3551_s16), 31  ;;  %s3790_s17 = sshll.u32 %s5706_s10, 7 }
  0x12   : > { %s3552_s18 = sshll.u32 %s5706_s10, 5  ;;  %s4410_s21 = scalar_lea.vmem %s5637_s0, %s3790_s17 }
  0x13   : > { %s352_s22 = sadd.s32 %s3552_s18, %s5708_s16  ;;  %360 = sbr.rel (%p3554_p7) target bundleno = 307 (0x133), region = 60 }
  0x14   : > { %s3553_s23 = sshll.u32 %s352_s22, 2 }
  0x15   : > { %s4415_s26 = scalar_lea.vmem %s5646_s9, %s3553_s23 }
  0x18   : > { %v515_v0 = vld [vmem:[%s5638_s1] sm:$0x3]  ;;  %vm652_vm0 = vcmask 1041408   ;;  %vm603_vm1 = vcmask 31744   ;;  %vm361_vm2 = vcmask 27648   ;;  %v4251_v4 = vld [vmem:[%s4410_s21 + $0x8] sm:$0xff]  }
  0x19   : > { %v4249_v1 = vld [vmem:[%s4410_s21] sm:$0xff]   ;;  %4194 = vmatprep.subr.msk.bf16.mxu0 %vm652_vm0, %v515_v0  ;;  %4195 = vmatprep.subr.msk.bf16.mxu1 %vm652_vm0, %v515_v0  ;;  %v654_v2 = vsel %vm652_vm0, %v515_v0, 0  ;;  %v4252_v5 = vld [vmem:[%s4410_s21 + $0x48] sm:$0xff]   ;;  %v4323_v6 = vmov 0   ;;  %vm364_vm3 = vcmask 24576   ;;  %v4253_v7 = vld [vmem:[%s4410_s21 + $0x10] sm:$0xff]  }
  0x1a   : > { %3959 = vmatpush3.bf16.msra.mxu0 %v654_v2  ;;  %4191 = vmatpush3.bf16.msra.mxu1 %v654_v2  ;;  %v4250_v3 = vld [vmem:[%s4410_s21 + $0x40] sm:$0xff]   ;;  %362 = vst.msk [vmem:[#allocation2] sm:$0xf] %vm361_vm2, %v4323_v6  ;;  %363 = vst.msk [vmem:[#allocation2 + $0x4] sm:$0xf] %vm361_vm2, %v4323_v6  ;;  %v4254_v8 = vld [vmem:[%s4410_s21 + $0x50] sm:$0xff]  }
  0x1b   : > { %3960 = vmatprep.mubr.msk.bf16.mxu0 %vm603_vm1, %v4249_v1  ;;  %3976 = vmatprep.mubr.msk.bf16.mxu1 %vm603_vm1, %v4250_v3  ;;  %367 = vst.msk [vmem:[#allocation2 + $0xcc] sm:$0xf] %vm361_vm2, %v4323_v6  ;;  %368 = vst.msk [vmem:[#allocation2 + $0xd0] sm:$0xf] %vm361_vm2, %v4323_v6  ;;  %v4255_v9 = vld [vmem:[%s4410_s21 + $0x18] sm:$0xff]   ;;  %v4257_v11 = vld [vmem:[%s4410_s21 + $0x20] sm:$0xff]  }
  0x1c   : > { %365 = vst.msk [vmem:[#allocation2 + $0x8] sm:$0x1] %vm364_vm3, %v4323_v6  ;;  %369 = vst.msk [vmem:[#allocation2 + $0xd4] sm:$0x1] %vm364_vm3, %v4323_v6  ;;  %v4256_v10 = vld [vmem:[%s4410_s21 + $0x58] sm:$0xff]   ;;  %v4258_v12 = vld [vmem:[%s4410_s21 + $0x60] sm:$0xff]  }
  0x1d   : > { %3961 = vmatmul.mubr.msk.bf16.vlgmr.msra.gmra.mxu0 %vm603_vm1, %v4251_v4  ;;  %3977 = vmatmul.mubr.msk.bf16.vlgmr.msra.gmra.mxu1 %vm603_vm1, %v4252_v5  ;;  %v4259_v13 = vld [vmem:[%s4410_s21 + $0x28] sm:$0xff]   ;;  %v4261_v15 = vld [vmem:[%s4410_s21 + $0x30] sm:$0xff]   ;;  %vm371_vm4 = vsmask.f32 256  ;;  %v379_v18 = vld [vmem:[#allocation2 + $0x18] sm:$0x1] }
  0x1e   : > { %3964 = vmatprep.mubr.msk.bf16.mxu0 %vm603_vm1, %v4253_v7  ;;  %3980 = vmatprep.mubr.msk.bf16.mxu1 %vm603_vm1, %v4254_v8  ;;  %v4260_v14 = vld [vmem:[%s4410_s21 + $0x68] sm:$0xff]   ;;  %vm4452_vm5 = vmand %vm364_vm3, %vm371_vm4  ;;  %vm427_vm6 = vsmask.f32 7938  ;;  %v4262_v24 = vld [vmem:[%s4410_s21 + $0x70] sm:$0xff]   ;;  %vm945_vm8 = vsmask.f32 4368 }
  0x1f   : > { %v380_v20 = vsel %vm4452_vm5, 0, %v379_v18  ;;  %vm4462_vm7 = vmand %vm364_vm3, %vm427_vm6  ;;  %v4263_v29 = vld [vmem:[%s4410_s21 + $0x38] sm:$0xff]   ;;  %v376_v33 = vld [vmem:[#allocation2 + $0xc] sm:$0x1] }
  0x20   : > { %381 = vst [vmem:[#allocation2 + $0x18] sm:$0x1] %v380_v20  ;;  %v4264_v30 = vld [vmem:[%s4410_s21 + $0x78] sm:$0xff]   ;;  %v400_v34 = vld [vmem:[#allocation2 + $0x6c] sm:$0x1]  ;;  %v377_v35 = vsel %vm4452_vm5, 0, %v376_v33  ;;  %vm4556_vm9 = vmand %vm361_vm2, %vm427_vm6 }
  0x21   : > { %v373_v17 = vld [vmem:[#allocation2] sm:$0x1]  ;;  %v403_v31 = vld [vmem:[#allocation2 + $0x78] sm:$0x1]  ;;  %v401_v36 = vsel %vm4452_vm5, 0, %v400_v34  ;;  %vm4574_vm10 = vmor %vm371_vm4, %vm945_vm8 }
  0x22   : > { %v374_v19 = vsel %vm4452_vm5, 0, %v373_v17  ;;  %v424_v21 = vld [vmem:[#allocation2 + $0xcc] sm:$0x1]  ;;  %v404_v32 = vsel %vm4452_vm5, 0, %v403_v31  ;;  %378 = vst [vmem:[#allocation2 + $0xc] sm:$0x1] %v377_v35 }
  0x23   : > { %v429_v23 = vld [vmem:[#allocation2 + $0x8] sm:$0x1]  ;;  %375 = vst [vmem:[#allocation2] sm:$0x1] %v374_v19  ;;  %v425_v25 = vsel %vm4452_vm5, 0, %v424_v21 }
  0x24   : > { %v430_v26 = vsel %vm4462_vm7, 0, %v429_v23  ;;  %v480_v27 = vld [vmem:[#allocation2 + $0xd4] sm:$0x1]  ;;  %426 = vst [vmem:[#allocation2 + $0xcc] sm:$0x1] %v425_v25 }
  0x25   : > { %3965 = vmatmul.mubr.msk.bf16.gmra.mxu0 %vm603_vm1, %v4255_v9  ;;  %3981 = vmatmul.mubr.msk.bf16.gmra.mxu1 %vm603_vm1, %v4256_v10  ;;  %431 = vst [vmem:[#allocation2 + $0x8] sm:$0x1] %v430_v26  ;;  %v481_v28 = vsel %vm4462_vm7, 0, %v480_v27  ;;  %405 = vst [vmem:[#allocation2 + $0x78] sm:$0x1] %v404_v32 }
  0x26   : > { %3968 = vmatprep.mubr.msk.bf16.mxu0 %vm603_vm1, %v4257_v11  ;;  %3984 = vmatprep.mubr.msk.bf16.mxu1 %vm603_vm1, %v4258_v12  ;;  %482 = vst [vmem:[#allocation2 + $0xd4] sm:$0x1] %v481_v28  ;;  %402 = vst [vmem:[#allocation2 + $0x6c] sm:$0x1] %v401_v36  ;;  %v435_v37 = vld [vmem:[#allocation2 + $0x20] sm:$0x1] }
  0x27   : > { %v459_v38 = vld [vmem:[#allocation2 + $0x80] sm:$0x1]  ;;  %v436_v39 = vsel %vm4462_vm7, 0, %v435_v37  ;;  %v432_v41 = vld [vmem:[#allocation2 + $0x14] sm:$0x1] }
  0x28   : > { %v460_v40 = vsel %vm4462_vm7, 0, %v459_v38  ;;  %437 = vst [vmem:[#allocation2 + $0x20] sm:$0x1] %v436_v39  ;;  %v433_v42 = vsel %vm4462_vm7, 0, %v432_v41  ;;  %v456_v43 = vld [vmem:[#allocation2 + $0x74] sm:$0x1] }
  0x29   : > { %461 = vst [vmem:[#allocation2 + $0x80] sm:$0x1] %v460_v40  ;;  %434 = vst [vmem:[#allocation2 + $0x14] sm:$0x1] %v433_v42  ;;  %v457_v44 = vsel %vm4462_vm7, 0, %v456_v43 }
  0x2a   : > { %458 = vst [vmem:[#allocation2 + $0x74] sm:$0x1] %v457_v44  ;;  %v385_v45 = vld [vmem:[#allocation2 + $0x30] sm:$0x1]  ;;  %v382_v49 = vld [vmem:[#allocation2 + $0x24] sm:$0x1] }
  0x2b   : > { %v409_v46 = vld [vmem:[#allocation2 + $0x90] sm:$0x1]  ;;  %v386_v47 = vsel %vm4452_vm5, 0, %v385_v45  ;;  %v383_v50 = vsel %vm4452_vm5, 0, %v382_v49  ;;  %v406_v51 = vld [vmem:[#allocation2 + $0x84] sm:$0x1] }
  0x2c   : > { %v410_v48 = vsel %vm4452_vm5, 0, %v409_v46  ;;  %387 = vst [vmem:[#allocation2 + $0x30] sm:$0x1] %v386_v47  ;;  %384 = vst [vmem:[#allocation2 + $0x24] sm:$0x1] %v383_v50  ;;  %v407_v52 = vsel %vm4452_vm5, 0, %v406_v51 }
  0x2d   : > { %3969 = vmatmul.mubr.msk.bf16.gmra.mxu0 %vm603_vm1, %v4259_v13  ;;  %3985 = vmatmul.mubr.msk.bf16.gmra.mxu1 %vm603_vm1, %v4260_v14  ;;  %411 = vst [vmem:[#allocation2 + $0x90] sm:$0x1] %v410_v48  ;;  %408 = vst [vmem:[#allocation2 + $0x84] sm:$0x1] %v407_v52  ;;  %v441_v53 = vld [vmem:[#allocation2 + $0x38] sm:$0x1] }
  0x2e   : > { %3972 = vmatprep.mubr.msk.bf16.mxu0 %vm603_vm1, %v4261_v15  ;;  %3988 = vmatprep.mubr.msk.bf16.mxu1 %vm603_vm1, %v4262_v24  ;;  %v442_v54 = vsel %vm4462_vm7, 0, %v441_v53  ;;  %v465_v55 = vld [vmem:[#allocation2 + $0x98] sm:$0x1]  ;;  %v438_v57 = vld [vmem:[#allocation2 + $0x2c] sm:$0x1] }
  0x2f   : > { %443 = vst [vmem:[#allocation2 + $0x38] sm:$0x1] %v442_v54  ;;  %v466_v56 = vsel %vm4462_vm7, 0, %v465_v55  ;;  %v462_v58 = vld [vmem:[#allocation2 + $0x8c] sm:$0x1]  ;;  %v439_v59 = vsel %vm4462_vm7, 0, %v438_v57 }
  0x30   : > { %467 = vst [vmem:[#allocation2 + $0x98] sm:$0x1] %v466_v56  ;;  %v463_v60 = vsel %vm4462_vm7, 0, %v462_v58  ;;  %440 = vst [vmem:[#allocation2 + $0x2c] sm:$0x1] %v439_v59 }
  0x31   : > { %464 = vst [vmem:[#allocation2 + $0x8c] sm:$0x1] %v463_v60  ;;  %v391_v61 = vld [vmem:[#allocation2 + $0x48] sm:$0x1]  ;;  %v388_v1 = vld [vmem:[#allocation2 + $0x3c] sm:$0x1] }
  0x32   : > { %v392_v62 = vsel %vm4452_vm5, 0, %v391_v61  ;;  %v415_v63 = vld [vmem:[#allocation2 + $0xa8] sm:$0x1]  ;;  %v389_v2 = vsel %vm4452_vm5, 0, %v388_v1  ;;  %v412_v3 = vld [vmem:[#allocation2 + $0x9c] sm:$0x1] }
  0x33   : > { %393 = vst [vmem:[#allocation2 + $0x48] sm:$0x1] %v392_v62  ;;  %v416_v0 = vsel %vm4452_vm5, 0, %v415_v63  ;;  %390 = vst [vmem:[#allocation2 + $0x3c] sm:$0x1] %v389_v2  ;;  %v413_v4 = vsel %vm4452_vm5, 0, %v412_v3 }
  0x34   : > { %417 = vst [vmem:[#allocation2 + $0xa8] sm:$0x1] %v416_v0  ;;  %414 = vst [vmem:[#allocation2 + $0x9c] sm:$0x1] %v413_v4  ;;  %v447_v5 = vld [vmem:[#allocation2 + $0x50] sm:$0x1] }
  0x35   : > { %3973 = vmatmul.mubr.msk.bf16.gmra.mxu0 %vm603_vm1, %v4263_v29  ;;  %3989 = vmatmul.mubr.msk.bf16.gmra.mxu1 %vm603_vm1, %v4264_v30  ;;  %v471_v6 = vld [vmem:[#allocation2 + $0xb0] sm:$0x1]  ;;  %v448_v7 = vsel %vm4462_vm7, 0, %v447_v5  ;;  %v444_v9 = vld [vmem:[#allocation2 + $0x44] sm:$0x1] }
  0x36   : > { %v472_v8 = vsel %vm4462_vm7, 0, %v471_v6  ;;  %449 = vst [vmem:[#allocation2 + $0x50] sm:$0x1] %v448_v7  ;;  %v468_v10 = vld [vmem:[#allocation2 + $0xa4] sm:$0x1]  ;;  %v445_v11 = vsel %vm4462_vm7, 0, %v444_v9 }
  0x37   : > { %473 = vst [vmem:[#allocation2 + $0xb0] sm:$0x1] %v472_v8  ;;  %v469_v12 = vsel %vm4462_vm7, 0, %v468_v10  ;;  %446 = vst [vmem:[#allocation2 + $0x44] sm:$0x1] %v445_v11 }
  0x38   : > { %470 = vst [vmem:[#allocation2 + $0xa4] sm:$0x1] %v469_v12  ;;  %v397_v13 = vld [vmem:[#allocation2 + $0x60] sm:$0x1]  ;;  %v394_v18 = vld [vmem:[#allocation2 + $0x54] sm:$0x1] }
  0x39   : > { %v398_v14 = vsel %vm4452_vm5, 0, %v397_v13  ;;  %v421_v15 = vld [vmem:[#allocation2 + $0xc0] sm:$0x1]  ;;  %v418_v19 = vld [vmem:[#allocation2 + $0xb4] sm:$0x1]  ;;  %v395_v20 = vsel %vm4452_vm5, 0, %v394_v18 }
  0x3a   : > { %399 = vst [vmem:[#allocation2 + $0x60] sm:$0x1] %v398_v14  ;;  %v422_v17 = vsel %vm4452_vm5, 0, %v421_v15  ;;  %v419_v21 = vsel %vm4452_vm5, 0, %v418_v19  ;;  %396 = vst [vmem:[#allocation2 + $0x54] sm:$0x1] %v395_v20 }
  0x3b   : > { %423 = vst [vmem:[#allocation2 + $0xc0] sm:$0x1] %v422_v17  ;;  %420 = vst [vmem:[#allocation2 + $0xb4] sm:$0x1] %v419_v21  ;;  %v453_v23 = vld [vmem:[#allocation2 + $0x68] sm:$0x1] }
  0x3c   : > { %v477_v24 = vld [vmem:[#allocation2 + $0xc8] sm:$0x1]  ;;  %v454_v25 = vsel %vm4462_vm7, 0, %v453_v23  ;;  %v450_v27 = vld [vmem:[#allocation2 + $0x5c] sm:$0x1] }
  0x3d   : > { %v478_v26 = vsel %vm4462_vm7, 0, %v477_v24  ;;  %455 = vst [vmem:[#allocation2 + $0x68] sm:$0x1] %v454_v25  ;;  %v451_v28 = vsel %vm4462_vm7, 0, %v450_v27  ;;  %v474_v29 = vld [vmem:[#allocation2 + $0xbc] sm:$0x1] }
  0x3e   : > { %479 = vst [vmem:[#allocation2 + $0xc8] sm:$0x1] %v478_v26  ;;  %452 = vst [vmem:[#allocation2 + $0x5c] sm:$0x1] %v451_v28  ;;  %v475_v30 = vsel %vm4462_vm7, 0, %v474_v29 }
  0x3f   : > { %476 = vst [vmem:[#allocation2 + $0xbc] sm:$0x1] %v475_v30  ;;  %v4546_v31 = vld [vmem:[%s5639_s2] ss:$0 sm:$0xff]  ;;  %v1277_v0 = vld [vmem:[#allocation2 + $0x18] sm:$0xf] }
  0x40   : > { %v1333_v7 = vld [vmem:[#allocation2 + $0x78] sm:$0xf]  ;;  %v1270_v12 = vld [vmem:[#allocation2 + $0xc] sm:$0xf]  ;;  %v1281_v28 = vld [vmem:[#allocation2 + $0x20] sm:$0x1] }
  0x41   : > { %v1326_v21 = vld [vmem:[#allocation2 + $0x6c] sm:$0xf] }
  0xdd   : > { %v3962_v32 = vpop.f32.mrf.mxu0  ;;  %v3978_v34 = vpop.f32.mrf.mxu1 }
  0xde   : > { %v699_v33 = vadd.f32 %v3962_v32, %v4546_v31  ;;  %v763_v35 = vadd.f32 %v3978_v34, %v4546_v31 }
  0xdf   : > { %v690_v36 = vpop.f32.mrf.mxu0  ;;  %v754_v39 = vpop.f32.mrf.mxu1 }
  0xe0   : > { %v819_v37 = vmax.f32 %v699_v33, 0.0  ;;  %v691_v38 = vadd.f32 %v4546_v31, %v690_v36  ;;  %v835_v40 = vmax.f32 %v763_v35, 0.0  ;;  %v755_v22 = vadd.f32 %v4546_v31, %v754_v39 }
  0xe1   : > { %v3963_v41 = vpop.f32.mrf.mxu0  ;;  %v3979_v45 = vpop.f32.mrf.mxu1 }
  0xe2   : > { %v3793_v42 = vpack.c.bf16 %v819_v37, %v819_v37  ;;  %v817_v43 = vmax.f32 %v691_v38, 0.0  ;;  %v702_v44 = vadd.f32 %v3963_v41, %v4546_v31  ;;  %v3809_v46 = vpack.c.bf16 %v835_v40, %v835_v40 }
  0xe3   : > { %v833_v47 = vmax.f32 %v755_v22, 0.0  ;;  %v766_v48 = vadd.f32 %v3979_v45, %v4546_v31  ;;  %v693_v57 = vpop.f32.mrf.mxu0  ;;  %v757_v58 = vpop.f32.mrf.mxu1 }
  0xe4   : > { %v965_v49 = vshrl.u32 %v3793_v42, 16  ;;  %v968_v50 = vshll.u32 %v3793_v42, 16  ;;  %v3791_v51 = vpack.c.bf16 %v817_v43, %v817_v43  ;;  %v820_v52 = vmax.f32 %v702_v44, 0.0  ;;  %v1337_v42 = vld [vmem:[#allocation2 + $0x80] sm:$0x1] }
  0xe5   : > { %v1101_v53 = vshrl.u32 %v3809_v46, 16  ;;  %v1104_v54 = vshll.u32 %v3809_v46, 16  ;;  %v3807_v55 = vpack.c.bf16 %v833_v47, %v833_v47  ;;  %v836_v56 = vmax.f32 %v766_v48, 0.0  ;;  %v3966_v15 = vpop.f32.mrf.mxu0  ;;  %v3982_v17 = vpop.f32.mrf.mxu1 }
  0xe6   : > { %v967_v59 = vrot.slane %v965_v49, 7  ;;  %v948_v60 = vshrl.u32 %v3791_v51, 16  ;;  %v951_v61 = vshll.u32 %v3791_v51, 16  ;;  %v3794_v62 = vpack.c.bf16 %v820_v52, %v820_v52 }
  0xe7   : > { %v1103_v1 = vrot.slane %v1101_v53, 7  ;;  %v1084_v2 = vshrl.u32 %v3807_v55, 16  ;;  %v1087_v3 = vshll.u32 %v3807_v55, 16  ;;  %v3810_v4 = vpack.c.bf16 %v836_v56, %v836_v56  ;;  %v706_v39 = vpop.f32.mrf.mxu0  ;;  %v770_v40 = vpop.f32.mrf.mxu1 }
  0xe8   : > { %v970_v5 = vor.u32 %v968_v50, %v967_v59  ;;  %v971_v6 = vrot.slane %v967_v59, 4  ;;  %v4560_v8 = vrot.slane %v948_v60, 7  ;;  %v973_v9 = vshrl.u32 %v3794_v62, 16 }
  0xe9   : > { %v1106_v10 = vor.u32 %v1104_v54, %v1103_v1  ;;  %v1107_v11 = vrot.slane %v1103_v1, 4  ;;  %v4562_v13 = vrot.slane %v1084_v2, 7  ;;  %v976_v14 = vshll.u32 %v3794_v62, 16  ;;  %v3983_v62 = vpop.f32.mrf.mxu1 }
  0xea   : > { %v1278_v18 = vsel %vm4556_vm9, %v970_v5, %v1277_v0  ;;  %v953_v19 = vor.u32 %v951_v61, %v4560_v8  ;;  %v954_v20 = vrot.slane %v4560_v8, 4  ;;  %v975_v23 = vrot.slane %v973_v9, 7 }
  0xeb   : > { %1279 = vst [vmem:[#allocation2 + $0x18] sm:$0xf] %v1278_v18  ;;  %v1334_v24 = vsel %vm4556_vm9, %v1106_v10, %v1333_v7  ;;  %v1089_v25 = vor.u32 %v1087_v3, %v4562_v13  ;;  %v1090_v26 = vrot.slane %v4562_v13, 4  ;;  %v1109_v29 = vshrl.u32 %v3810_v4, 16 }
  0xec   : > { %1335 = vst [vmem:[#allocation2 + $0x78] sm:$0xf] %v1334_v24  ;;  %v1271_v30 = vsel %vm4556_vm9, %v953_v19, %v1270_v12  ;;  %v978_v32 = vor.u32 %v976_v14, %v975_v23  ;;  %v980_v33 = vrot.slane %v975_v23, 4  ;;  %v1112_v34 = vshll.u32 %v3810_v4, 16  ;;  %v773_v24 = vpop.f32.mrf.mxu1 }
  0xed   : > { %1272 = vst [vmem:[#allocation2 + $0xc] sm:$0xf] %v1271_v30  ;;  %v1327_v35 = vsel %vm4556_vm9, %v1089_v25, %v1326_v21  ;;  %v1111_v36 = vrot.slane %v1109_v29, 7  ;;  %v694_v37 = vadd.f32 %v4546_v31, %v693_v57  ;;  %v758_v38 = vadd.f32 %v4546_v31, %v757_v58  ;;  %v3967_v57 = vpop.f32.mrf.mxu0 }
  0xee   : > { %1328 = vst [vmem:[#allocation2 + $0x6c] sm:$0xf] %v1327_v35  ;;  %v979_v22 = vsel %vm4574_vm10, %v971_v6, %v978_v32  ;;  %v1282_v41 = vsel %vm4452_vm5, %v980_v33, %v1281_v28  ;;  %v715_v43 = vadd.f32 %v3966_v15, %v4546_v31  ;;  %v779_v44 = vadd.f32 %v3982_v17, %v4546_v31  ;;  %v1274_v15 = vld [vmem:[#allocation2 + $0x14] sm:$0x1]  ;;  %v1291_v32 = vld [vmem:[#allocation2 + $0x30] sm:$0xf] }
  0xef   : > { %1280 = vst.msk [vmem:[#allocation2 + $0x1c] sm:$0xf] %vm361_vm2, %v979_v22  ;;  %1283 = vst [vmem:[#allocation2 + $0x20] sm:$0x1] %v1282_v41  ;;  %v1114_v45 = vor.u32 %v1112_v34, %v1111_v36  ;;  %v1116_v46 = vrot.slane %v1111_v36, 4  ;;  %v818_v47 = vmax.f32 %v694_v37, 0.0  ;;  %v707_v51 = vadd.f32 %v4546_v31, %v706_v39  ;;  %v709_v14 = vpop.f32.mrf.mxu0 }
  0xf0   : > { %v834_v48 = vmax.f32 %v758_v38, 0.0  ;;  %v823_v49 = vmax.f32 %v715_v43, 0.0  ;;  %v839_v50 = vmax.f32 %v779_v44, 0.0  ;;  %v771_v52 = vadd.f32 %v4546_v31, %v770_v40  ;;  %v1330_v17 = vld [vmem:[#allocation2 + $0x74] sm:$0x1]  ;;  %v3986_v43 = vpop.f32.mrf.mxu1 }
  0xf1   : > { %v1115_v53 = vsel %vm4574_vm10, %v1107_v11, %v1114_v45  ;;  %v1338_v54 = vsel %vm4452_vm5, %v1116_v46, %v1337_v42  ;;  %v3792_v55 = vpack.c.bf16 %v818_v47, %v818_v47  ;;  %v821_v60 = vmax.f32 %v707_v51, 0.0  ;;  %v1347_v33 = vld [vmem:[#allocation2 + $0x90] sm:$0xf]  ;;  %v3970_v41 = vpop.f32.mrf.mxu0  ;;  %v1284_v51 = vld [vmem:[#allocation2 + $0x24] sm:$0xf] }
  0xf2   : > { %v3808_v56 = vpack.c.bf16 %v834_v48, %v834_v48  ;;  %1336 = vst.msk [vmem:[#allocation2 + $0x7c] sm:$0xf] %vm361_vm2, %v1115_v53  ;;  %1339 = vst [vmem:[#allocation2 + $0x80] sm:$0x1] %v1338_v54  ;;  %v3797_v58 = vpack.c.bf16 %v823_v49, %v823_v49  ;;  %v3813_v59 = vpack.c.bf16 %v839_v50, %v839_v50  ;;  %v837_v61 = vmax.f32 %v771_v52, 0.0 }
  0xf3   : > { %v956_v0 = vshrl.u32 %v3792_v55, 16  ;;  %v959_v1 = vshll.u32 %v3792_v55, 16  ;;  %v3795_v11 = vpack.c.bf16 %v821_v60, %v821_v60  ;;  %v718_v21 = vadd.f32 %v3967_v57, %v4546_v31 }
  0xf4   : > { %v1092_v2 = vshrl.u32 %v3808_v56, 16  ;;  %v1095_v3 = vshll.u32 %v3808_v56, 16  ;;  %v999_v4 = vshrl.u32 %v3797_v58, 16  ;;  %v1002_v5 = vshll.u32 %v3797_v58, 16  ;;  %v1340_v58 = vld [vmem:[#allocation2 + $0x84] sm:$0xf] }
  0xf5   : > { %v1135_v6 = vshrl.u32 %v3813_v59, 16  ;;  %v1138_v7 = vshll.u32 %v3813_v59, 16  ;;  %v958_v9 = vrot.slane %v956_v0, 7  ;;  %v3811_v12 = vpack.c.bf16 %v837_v61, %v837_v61 }
  0xf6   : > { %v1094_v10 = vrot.slane %v1092_v2, 7  ;;  %v4598_v18 = vrot.slane %v999_v4, 7  ;;  %v782_v23 = vadd.f32 %v3983_v62, %v4546_v31  ;;  %v982_v13 = vshrl.u32 %v3795_v11, 16 }
  0xf7   : > { %v4600_v19 = vrot.slane %v1135_v6, 7  ;;  %v961_v25 = vor.u32 %v959_v1, %v958_v9  ;;  %v963_v28 = vrot.slane %v958_v9, 4  ;;  %v985_v42 = vshll.u32 %v3795_v11, 16  ;;  %v722_v6 = vpop.f32.mrf.mxu0 }
  0xf8   : > { %v1097_v29 = vor.u32 %v1095_v3, %v1094_v10  ;;  %v1099_v30 = vrot.slane %v1094_v10, 4  ;;  %v1004_v34 = vor.u32 %v1002_v5, %v4598_v18  ;;  %v1005_v35 = vrot.slane %v4598_v18, 4 }
  0xf9   : > { %v1140_v36 = vor.u32 %v1138_v7, %v4600_v19  ;;  %v1141_v37 = vrot.slane %v4600_v19, 4  ;;  %v962_v38 = vsel %vm4574_vm10, %v954_v20, %v961_v25  ;;  %v1275_v39 = vsel %vm4452_vm5, %v963_v28, %v1274_v15  ;;  %v1351_v25 = vld [vmem:[#allocation2 + $0x98] sm:$0x1] }
  0xfa   : > { %v1098_v40 = vsel %vm4574_vm10, %v1090_v26, %v1097_v29  ;;  %v1331_v22 = vsel %vm4452_vm5, %v1099_v30, %v1330_v17  ;;  %1273 = vst.msk [vmem:[#allocation2 + $0x10] sm:$0xf] %vm361_vm2, %v962_v38  ;;  %1276 = vst [vmem:[#allocation2 + $0x14] sm:$0x1] %v1275_v39  ;;  %v1292_v8 = vsel %vm4556_vm9, %v1004_v34, %v1291_v32  ;;  %v1118_v26 = vshrl.u32 %v3811_v12, 16  ;;  %v786_v30 = vpop.f32.mrf.mxu1  ;;  %v3971_v38 = vpop.f32.mrf.mxu0 }
  0xfb   : > { %1329 = vst.msk [vmem:[#allocation2 + $0x70] sm:$0xf] %vm361_vm2, %v1098_v40  ;;  %1332 = vst [vmem:[#allocation2 + $0x74] sm:$0x1] %v1331_v22  ;;  %v1348_v20 = vsel %vm4556_vm9, %v1140_v36, %v1347_v33  ;;  %v1121_v44 = vshll.u32 %v3811_v12, 16  ;;  %v824_v45 = vmax.f32 %v718_v21, 0.0  ;;  %v710_v48 = vadd.f32 %v4546_v31, %v709_v14 }
  0xfc   : > { %1293 = vst [vmem:[#allocation2 + $0x30] sm:$0xf] %v1292_v8  ;;  %1349 = vst [vmem:[#allocation2 + $0x90] sm:$0xf] %v1348_v20  ;;  %v840_v46 = vmax.f32 %v782_v23, 0.0  ;;  %v4626_v47 = vrot.slane %v982_v13, 7  ;;  %v774_v49 = vadd.f32 %v4546_v31, %v773_v24  ;;  %v731_v50 = vadd.f32 %v3970_v41, %v4546_v31 }
  0xfd   : > { %v4631_v52 = vrot.slane %v1118_v26, 7  ;;  %v3798_v53 = vpack.c.bf16 %v824_v45, %v824_v45  ;;  %v795_v55 = vadd.f32 %v3986_v43, %v4546_v31  ;;  %v822_v59 = vmax.f32 %v710_v48, 0.0  ;;  %v1295_v12 = vld [vmem:[#allocation2 + $0x38] sm:$0x1]  ;;  %v1288_v22 = vld [vmem:[#allocation2 + $0x2c] sm:$0x1] }
  0xfe   : > { %v3814_v54 = vpack.c.bf16 %v840_v46, %v840_v46  ;;  %v987_v56 = vor.u32 %v985_v42, %v4626_v47  ;;  %v988_v57 = vrot.slane %v4626_v47, 4  ;;  %v838_v60 = vmax.f32 %v774_v49, 0.0  ;;  %v3987_v46 = vpop.f32.mrf.mxu1  ;;  %v725_v49 = vpop.f32.mrf.mxu0 }
  0xff   : > { %v1123_v61 = vor.u32 %v1121_v44, %v4631_v52  ;;  %v1124_v62 = vrot.slane %v4631_v52, 4  ;;  %v1007_v0 = vshrl.u32 %v3798_v53, 16  ;;  %v1010_v1 = vshll.u32 %v3798_v53, 16 }
 0x100   : > { %v1285_v2 = vsel %vm4556_vm9, %v987_v56, %v1284_v51  ;;  %v1143_v3 = vshrl.u32 %v3814_v54, 16  ;;  %v1146_v4 = vshll.u32 %v3814_v54, 16  ;;  %v3796_v5 = vpack.c.bf16 %v822_v59, %v822_v59  ;;  %v1305_v54 = vld [vmem:[#allocation2 + $0x48] sm:$0xf] }
 0x101   : > { %1286 = vst [vmem:[#allocation2 + $0x24] sm:$0xf] %v1285_v2  ;;  %v1341_v7 = vsel %vm4556_vm9, %v1123_v61, %v1340_v58  ;;  %v1009_v9 = vrot.slane %v1007_v0, 7  ;;  %v3812_v10 = vpack.c.bf16 %v838_v60, %v838_v60  ;;  %v827_v11 = vmax.f32 %v731_v50, 0.0  ;;  %v1361_v60 = vld [vmem:[#allocation2 + $0xa8] sm:$0xf]  ;;  %v789_v0 = vpop.f32.mrf.mxu1 }
 0x102   : > { %1342 = vst [vmem:[#allocation2 + $0x84] sm:$0xf] %v1341_v7  ;;  %v1145_v14 = vrot.slane %v1143_v3, 7  ;;  %v990_v15 = vshrl.u32 %v3796_v5, 16  ;;  %v993_v17 = vshll.u32 %v3796_v5, 16  ;;  %v843_v21 = vmax.f32 %v795_v55, 0.0 }
 0x103   : > { %v1012_v23 = vor.u32 %v1010_v1, %v1009_v9  ;;  %v1014_v24 = vrot.slane %v1009_v9, 4  ;;  %v1126_v28 = vshrl.u32 %v3812_v10, 16  ;;  %v1129_v29 = vshll.u32 %v3812_v10, 16 }
 0x104   : > { %v1148_v32 = vor.u32 %v1146_v4, %v1145_v14  ;;  %v1150_v33 = vrot.slane %v1145_v14, 4  ;;  %v992_v34 = vrot.slane %v990_v15, 7  ;;  %v3801_v36 = vpack.c.bf16 %v827_v11, %v827_v11  ;;  %v3974_v15 = vpop.f32.mrf.mxu0 }
 0x105   : > { %v1013_v39 = vsel %vm4574_vm10, %v1005_v35, %v1012_v23  ;;  %v1296_v40 = vsel %vm4452_vm5, %v1014_v24, %v1295_v12  ;;  %v1128_v41 = vrot.slane %v1126_v28, 7  ;;  %v3817_v8 = vpack.c.bf16 %v843_v21, %v843_v21  ;;  %v1344_v35 = vld [vmem:[#allocation2 + $0x8c] sm:$0x1] }
 0x106   : > { %1294 = vst.msk [vmem:[#allocation2 + $0x34] sm:$0xf] %vm361_vm2, %v1013_v39  ;;  %1297 = vst [vmem:[#allocation2 + $0x38] sm:$0x1] %v1296_v40  ;;  %v1149_v20 = vsel %vm4574_vm10, %v1141_v37, %v1148_v32  ;;  %v1352_v18 = vsel %vm4452_vm5, %v1150_v33, %v1351_v25  ;;  %v995_v13 = vor.u32 %v993_v17, %v992_v34  ;;  %v997_v42 = vrot.slane %v992_v34, 4  ;;  %v3990_v25 = vpop.f32.mrf.mxu1 }
 0x107   : > { %1350 = vst.msk [vmem:[#allocation2 + $0x94] sm:$0xf] %vm361_vm2, %v1149_v20  ;;  %1353 = vst [vmem:[#allocation2 + $0x98] sm:$0x1] %v1352_v18  ;;  %v1131_v43 = vor.u32 %v1129_v29, %v1128_v41  ;;  %v1133_v26 = vrot.slane %v1128_v41, 4  ;;  %v1033_v44 = vshrl.u32 %v3801_v36, 16  ;;  %v723_v53 = vadd.f32 %v4546_v31, %v722_v6  ;;  %v738_v18 = vpop.f32.mrf.mxu0 }
 0x108   : > { %v1036_v45 = vshll.u32 %v3801_v36, 16  ;;  %v996_v19 = vsel %vm4574_vm10, %v988_v57, %v995_v13  ;;  %v1289_v37 = vsel %vm4452_vm5, %v997_v42, %v1288_v22  ;;  %v1169_v47 = vshrl.u32 %v3817_v8, 16  ;;  %v1298_v34 = vld [vmem:[#allocation2 + $0x3c] sm:$0xf]  ;;  %v1309_v42 = vld [vmem:[#allocation2 + $0x50] sm:$0x1] }
 0x109   : > { %v1172_v48 = vshll.u32 %v3817_v8, 16  ;;  %1287 = vst.msk [vmem:[#allocation2 + $0x28] sm:$0xf] %vm361_vm2, %v996_v19  ;;  %1290 = vst [vmem:[#allocation2 + $0x2c] sm:$0x1] %v1289_v37  ;;  %v1132_v50 = vsel %vm4574_vm10, %v1124_v62, %v1131_v43  ;;  %v1345_v51 = vsel %vm4452_vm5, %v1133_v26, %v1344_v35  ;;  %v4665_v52 = vrot.slane %v1033_v44, 7  ;;  %v802_v44 = vpop.f32.mrf.mxu1 }
 0x10a   : > { %1343 = vst.msk [vmem:[#allocation2 + $0x88] sm:$0xf] %vm361_vm2, %v1132_v50  ;;  %1346 = vst [vmem:[#allocation2 + $0x8c] sm:$0x1] %v1345_v51  ;;  %v4669_v55 = vrot.slane %v1169_v47, 7  ;;  %v787_v56 = vadd.f32 %v4546_v31, %v786_v30  ;;  %v734_v57 = vadd.f32 %v3971_v38, %v4546_v31  ;;  %v798_v58 = vadd.f32 %v3987_v46, %v4546_v31 }
 0x10b   : > { %v1038_v59 = vor.u32 %v1036_v45, %v4665_v52  ;;  %v825_v61 = vmax.f32 %v723_v53, 0.0  ;;  %v726_v62 = vadd.f32 %v4546_v31, %v725_v49  ;;  %v1039_v1 = vrot.slane %v4665_v52, 4  ;;  %v1354_v22 = vld [vmem:[#allocation2 + $0x9c] sm:$0xf]  ;;  %v1365_v47 = vld [vmem:[#allocation2 + $0xb0] sm:$0x1] }
 0x10c   : > { %v1174_v2 = vor.u32 %v1172_v48, %v4669_v55  ;;  %v841_v3 = vmax.f32 %v787_v56, 0.0  ;;  %v828_v4 = vmax.f32 %v734_v57, 0.0  ;;  %v844_v7 = vmax.f32 %v798_v58, 0.0  ;;  %v1302_v52 = vld [vmem:[#allocation2 + $0x44] sm:$0x1]  ;;  %v3975_v57 = vpop.f32.mrf.mxu0 }
 0x10d   : > { %v1306_v5 = vsel %vm4556_vm9, %v1038_v59, %v1305_v54  ;;  %v3799_v6 = vpack.c.bf16 %v825_v61, %v825_v61  ;;  %v826_v9 = vmax.f32 %v726_v62, 0.0  ;;  %v1175_v10 = vrot.slane %v4669_v55, 4  ;;  %v3991_v62 = vpop.f32.mrf.mxu1 }
 0x10e   : > { %1307 = vst [vmem:[#allocation2 + $0x48] sm:$0xf] %v1306_v5  ;;  %v1362_v11 = vsel %vm4556_vm9, %v1174_v2, %v1361_v60  ;;  %v3815_v12 = vpack.c.bf16 %v841_v3, %v841_v3  ;;  %v3802_v14 = vpack.c.bf16 %v828_v4, %v828_v4  ;;  %v3818_v21 = vpack.c.bf16 %v844_v7, %v844_v7 }
 0x10f   : > { %1363 = vst [vmem:[#allocation2 + $0xa8] sm:$0xf] %v1362_v11  ;;  %v1016_v17 = vshrl.u32 %v3799_v6, 16  ;;  %v3800_v23 = vpack.c.bf16 %v826_v9, %v826_v9  ;;  %v790_v24 = vadd.f32 %v4546_v31, %v789_v0  ;;  %v1019_v28 = vshll.u32 %v3799_v6, 16 }
 0x110   : > { %v1152_v29 = vshrl.u32 %v3815_v12, 16  ;;  %v1155_v30 = vshll.u32 %v3815_v12, 16  ;;  %v1041_v32 = vshrl.u32 %v3802_v14, 16  ;;  %v1044_v36 = vshll.u32 %v3802_v14, 16 }
 0x111   : > { %v1018_v33 = vrot.slane %v1016_v17, 7  ;;  %v1177_v38 = vshrl.u32 %v3818_v21, 16  ;;  %v1024_v39 = vshrl.u32 %v3800_v23, 16  ;;  %v1180_v8 = vshll.u32 %v3818_v21, 16 }
 0x112   : > { %v4684_v40 = vrot.slane %v1152_v29, 7  ;;  %v1043_v41 = vrot.slane %v1041_v32, 7  ;;  %v1027_v20 = vshll.u32 %v3800_v23, 16  ;;  %v842_v26 = vmax.f32 %v790_v24, 0.0  ;;  %v1358_v23 = vld [vmem:[#allocation2 + $0xa4] sm:$0x1] }
 0x113   : > { %v1021_v13 = vor.u32 %v1019_v28, %v1018_v33  ;;  %v1179_v35 = vrot.slane %v1177_v38, 7  ;;  %v1026_v43 = vrot.slane %v1024_v39, 7  ;;  %v1022_v45 = vrot.slane %v1018_v33, 4 }
 0x114   : > { %v1157_v46 = vor.u32 %v1155_v30, %v4684_v40  ;;  %v1046_v19 = vor.u32 %v1044_v36, %v1043_v41  ;;  %v1048_v37 = vrot.slane %v1043_v41, 4  ;;  %v3816_v61 = vpack.c.bf16 %v842_v26, %v842_v26 }
 0x115   : > { %v1299_v48 = vsel %vm4556_vm9, %v1021_v13, %v1298_v34  ;;  %v1182_v49 = vor.u32 %v1180_v8, %v1179_v35  ;;  %v1184_v50 = vrot.slane %v1179_v35, 4  ;;  %v1029_v51 = vor.u32 %v1027_v20, %v1026_v43  ;;  %v741_v8 = vpop.f32.mrf.mxu0 }
 0x116   : > { %1300 = vst [vmem:[#allocation2 + $0x3c] sm:$0xf] %v1299_v48  ;;  %v1355_v53 = vsel %vm4556_vm9, %v1157_v46, %v1354_v22  ;;  %v1047_v54 = vsel %vm4574_vm10, %v1039_v1, %v1046_v19  ;;  %v1310_v55 = vsel %vm4452_vm5, %v1048_v37, %v1309_v42  ;;  %v1031_v56 = vrot.slane %v1026_v43, 4  ;;  %v1375_v43 = vld [vmem:[#allocation2 + $0xc0] sm:$0xf] }
 0x117   : > { %1356 = vst [vmem:[#allocation2 + $0x9c] sm:$0xf] %v1355_v53  ;;  %1308 = vst.msk [vmem:[#allocation2 + $0x4c] sm:$0xf] %vm361_vm2, %v1047_v54  ;;  %v1183_v58 = vsel %vm4574_vm10, %v1175_v10, %v1182_v49  ;;  %v1366_v59 = vsel %vm4452_vm5, %v1184_v50, %v1365_v47  ;;  %v1030_v60 = vsel %vm4574_vm10, %v1022_v45, %v1029_v51  ;;  %v1158_v4 = vrot.slane %v4684_v40, 4  ;;  %v805_v54 = vpop.f32.mrf.mxu1 }
 0x118   : > { %1311 = vst [vmem:[#allocation2 + $0x50] sm:$0x1] %v1310_v55  ;;  %1364 = vst.msk [vmem:[#allocation2 + $0xac] sm:$0xf] %vm361_vm2, %v1183_v58  ;;  %v1303_v0 = vsel %vm4452_vm5, %v1031_v56, %v1302_v52  ;;  %v747_v1 = vadd.f32 %v3974_v15, %v4546_v31  ;;  %v811_v2 = vadd.f32 %v3990_v25, %v4546_v31  ;;  %v1160_v5 = vshrl.u32 %v3816_v61, 16 }
 0x119   : > { %1367 = vst [vmem:[#allocation2 + $0xb0] sm:$0x1] %v1366_v59  ;;  %1301 = vst.msk [vmem:[#allocation2 + $0x40] sm:$0xf] %vm361_vm2, %v1030_v60  ;;  %v739_v3 = vadd.f32 %v4546_v31, %v738_v18  ;;  %v803_v6 = vadd.f32 %v4546_v31, %v802_v44  ;;  %v750_v7 = vadd.f32 %v3975_v57, %v4546_v31  ;;  %v1163_v17 = vshll.u32 %v3816_v61, 16 }
 0x11a   : > { %1304 = vst [vmem:[#allocation2 + $0x44] sm:$0x1] %v1303_v0  ;;  %v831_v9 = vmax.f32 %v747_v1, 0.0  ;;  %v847_v10 = vmax.f32 %v811_v2, 0.0  ;;  %v814_v12 = vadd.f32 %v3991_v62, %v4546_v31  ;;  %v1162_v14 = vrot.slane %v1160_v5, 7 }
 0x11b   : > { %v829_v11 = vmax.f32 %v739_v3, 0.0  ;;  %v845_v15 = vmax.f32 %v803_v6, 0.0  ;;  %v832_v21 = vmax.f32 %v750_v7, 0.0  ;;  %v1319_v18 = vld [vmem:[#allocation2 + $0x60] sm:$0xf]  ;;  %v742_v49 = vadd.f32 %v4546_v31, %v741_v8 }
 0x11c   : > { %v3805_v24 = vpack.c.bf16 %v831_v9, %v831_v9  ;;  %v3821_v25 = vpack.c.bf16 %v847_v10, %v847_v10  ;;  %v848_v29 = vmax.f32 %v814_v12, 0.0  ;;  %v1165_v30 = vor.u32 %v1163_v17, %v1162_v14  ;;  %v1312_v47 = vld [vmem:[#allocation2 + $0x54] sm:$0xf]  ;;  %v1323_v0 = vld [vmem:[#allocation2 + $0x68] sm:$0x1] }
 0x11d   : > { %v3803_v28 = vpack.c.bf16 %v829_v11, %v829_v11  ;;  %v1167_v32 = vrot.slane %v1162_v14, 4  ;;  %v3819_v33 = vpack.c.bf16 %v845_v15, %v845_v15  ;;  %v3806_v34 = vpack.c.bf16 %v832_v21, %v832_v21  ;;  %v1368_v58 = vld [vmem:[#allocation2 + $0xb4] sm:$0xf]  ;;  %v1379_v10 = vld [vmem:[#allocation2 + $0xc8] sm:$0x1] }
 0x11e   : > { %v1067_v36 = vshrl.u32 %v3805_v24, 16  ;;  %v1203_v38 = vshrl.u32 %v3821_v25, 16  ;;  %v1166_v39 = vsel %vm4574_vm10, %v1158_v4, %v1165_v30  ;;  %v1070_v22 = vshll.u32 %v3805_v24, 16 }
 0x11f   : > { %v1359_v40 = vsel %vm4452_vm5, %v1167_v32, %v1358_v23  ;;  %v1050_v41 = vshrl.u32 %v3803_v28, 16  ;;  %1357 = vst.msk [vmem:[#allocation2 + $0xa0] sm:$0xf] %vm361_vm2, %v1166_v39  ;;  %v1206_v42 = vshll.u32 %v3821_v25, 16  ;;  %v1186_v35 = vshrl.u32 %v3819_v33, 16 }
 0x120   : > { %1360 = vst [vmem:[#allocation2 + $0xa4] sm:$0x1] %v1359_v40  ;;  %v1069_v20 = vrot.slane %v1067_v36, 7  ;;  %v1205_v13 = vrot.slane %v1203_v38, 7  ;;  %v1053_v44 = vshll.u32 %v3803_v28, 16  ;;  %v1075_v45 = vshrl.u32 %v3806_v34, 16 }
 0x121   : > { %v1052_v26 = vrot.slane %v1050_v41, 7  ;;  %v3822_v46 = vpack.c.bf16 %v848_v29, %v848_v29  ;;  %v1189_v48 = vshll.u32 %v3819_v33, 16  ;;  %v1188_v51 = vrot.slane %v1186_v35, 7  ;;  %v1316_v28 = vld [vmem:[#allocation2 + $0x5c] sm:$0x1] }
 0x122   : > { %v1072_v19 = vor.u32 %v1070_v22, %v1069_v20  ;;  %v1208_v37 = vor.u32 %v1206_v42, %v1205_v13  ;;  %v1077_v52 = vrot.slane %v1075_v45, 7  ;;  %v1078_v53 = vshll.u32 %v3806_v34, 16  ;;  %v1372_v40 = vld [vmem:[#allocation2 + $0xbc] sm:$0x1] }
 0x123   : > { %v1055_v50 = vor.u32 %v1053_v44, %v1052_v26  ;;  %v1073_v55 = vrot.slane %v1069_v20, 4  ;;  %v1211_v59 = vshrl.u32 %v3822_v46, 16  ;;  %v1191_v61 = vor.u32 %v1189_v48, %v1188_v51 }
 0x124   : > { %v1320_v56 = vsel %vm4556_vm9, %v1072_v19, %v1319_v18  ;;  %v1376_v57 = vsel %vm4556_vm9, %v1208_v37, %v1375_v43  ;;  %v1080_v62 = vor.u32 %v1078_v53, %v1077_v52  ;;  %v1214_v1 = vshll.u32 %v3822_v46, 16 }
 0x125   : > { %1321 = vst [vmem:[#allocation2 + $0x60] sm:$0xf] %v1320_v56  ;;  %1377 = vst [vmem:[#allocation2 + $0xc0] sm:$0xf] %v1376_v57  ;;  %v1313_v60 = vsel %vm4556_vm9, %v1055_v50, %v1312_v47  ;;  %v1082_v2 = vrot.slane %v1077_v52, 4  ;;  %v1213_v3 = vrot.slane %v1211_v59, 7  ;;  %v806_v5 = vadd.f32 %v4546_v31, %v805_v54 }
 0x126   : > { %1314 = vst [vmem:[#allocation2 + $0x54] sm:$0xf] %v1313_v60  ;;  %v830_v4 = vmax.f32 %v742_v49, 0.0  ;;  %v1209_v6 = vrot.slane %v1205_v13, 4  ;;  %v1369_v7 = vsel %vm4556_vm9, %v1191_v61, %v1368_v58  ;;  %v1081_v9 = vsel %vm4574_vm10, %v1073_v55, %v1080_v62 }
 0x127   : > { %1370 = vst [vmem:[#allocation2 + $0xb4] sm:$0xf] %v1369_v7  ;;  %1322 = vst.msk [vmem:[#allocation2 + $0x64] sm:$0xf] %vm361_vm2, %v1081_v9  ;;  %v1324_v11 = vsel %vm4452_vm5, %v1082_v2, %v1323_v0  ;;  %v1216_v12 = vor.u32 %v1214_v1, %v1213_v3  ;;  %v1218_v14 = vrot.slane %v1213_v3, 4  ;;  %v846_v15 = vmax.f32 %v806_v5, 0.0 }
 0x128   : > { %v3804_v17 = vpack.c.bf16 %v830_v4, %v830_v4  ;;  %1325 = vst [vmem:[#allocation2 + $0x68] sm:$0x1] %v1324_v11  ;;  %v1056_v30 = vrot.slane %v1052_v26, 4  ;;  %v1192_v22 = vrot.slane %v1188_v51, 4 }
 0x129   : > { %v1217_v31 = vsel %vm4574_vm10, %v1209_v6, %v1216_v12  ;;  %v1380_v63 = vsel %vm4452_vm5, %v1218_v14, %v1379_v10  ;;  %v3820_v23 = vpack.c.bf16 %v846_v15, %v846_v15 }
 0x12a   : > { %v1058_v21 = vshrl.u32 %v3804_v17, 16  ;;  %1378 = vst.msk [vmem:[#allocation2 + $0xc4] sm:$0xf] %vm361_vm2, %v1217_v31  ;;  %1381 = vst [vmem:[#allocation2 + $0xc8] sm:$0x1] %v1380_v63  ;;  %v1061_v25 = vshll.u32 %v3804_v17, 16 }
 0x12b   : > { %v1194_v29 = vshrl.u32 %v3820_v23, 16  ;;  %v1197_v36 = vshll.u32 %v3820_v23, 16 }
 0x12c   : > { %v1060_v24 = vrot.slane %v1058_v21, 7 }
 0x12d   : > { %v1196_v34 = vrot.slane %v1194_v29, 7 }
 0x12e   : > { %v1063_v32 = vor.u32 %v1061_v25, %v1060_v24  ;;  %v1065_v33 = vrot.slane %v1060_v24, 4 }
 0x12f   : > { %v1199_v41 = vor.u32 %v1197_v36, %v1196_v34  ;;  %v1201_v8 = vrot.slane %v1196_v34, 4 }
 0x130   : > { %v1064_v38 = vsel %vm4574_vm10, %v1056_v30, %v1063_v32  ;;  %v1317_v39 = vsel %vm4452_vm5, %v1065_v33, %v1316_v28 }
 0x131   : > { %1315 = vst.msk [vmem:[#allocation2 + $0x58] sm:$0xf] %vm361_vm2, %v1064_v38  ;;  %1318 = vst [vmem:[#allocation2 + $0x5c] sm:$0x1] %v1317_v39  ;;  %v1200_v20 = vsel %vm4574_vm10, %v1192_v22, %v1199_v41  ;;  %v1373_v18 = vsel %vm4452_vm5, %v1201_v8, %v1372_v40 }
 0x132   : > { %1371 = vst.msk [vmem:[#allocation2 + $0xb8] sm:$0xf] %vm361_vm2, %v1200_v20  ;;  %1374 = vst [vmem:[#allocation2 + $0xbc] sm:$0x1] %v1373_v18 }
 0x133 PF: > { %v3623_v13 = vld [vmem:[%s5640_s3 + $0x2] sm:$0x3]  ;;  %vm1663_vm11 = vcmask 1041408   ;;  %s3823_s18 = smul.u32 96, %s4305_s30  ;;  %vm1417_vm12 = vsmask.f32 3328 }
 0x134   : > { %4197 = vmatprep.subr.msk.bf16.mxu1 %vm1663_vm11, %v3623_v13  ;;  %4196 = vmatprep.subr.msk.bf16.mxu0 %vm1663_vm11, %v3623_v13  ;;  %v1665_v27 = vsel %vm1663_vm11, %v3623_v13, 0  ;;  %v1416_v16 = vld [vmem:[%s5640_s3] sm:$0x3]  ;;  %vm1418_vm13 = vsmask.f32 7440  ;;  %vm1638_vm14 = vcmask 31744  }
 0x135   : > { %4193 = vmatpush3.bf16.msra.mxu1 %v1665_v27  ;;  %3993 = vmatpush3.bf16.msra.mxu0 %v1665_v27  ;;  %v4761_v42 = vld [vmem:[%s5640_s3 + $0x4] sm:$0x3]  ;;  %s4763_s24 = scalar_lea.vmem [#allocation2], %s3823_s18  ;;  %vm4804_vm15 = vmor %vm1417_vm12, %vm1418_vm13  ;;  %v4809_v5 = vsel %vm1663_vm11, %v1416_v16, 0  ;;  %vm1936_vm0 = vcmask 1042432   ;;  %vm1937_vm1 = vcmask 1046532  }
 0x136   : > { %4198 = vmatprep.subr.msk.bf16.mxu1 %vm1663_vm11, %v1416_v16  ;;  %4199 = vmatprep.subr.msk.bf16.mxu0 %vm1663_vm11, %v4761_v42  ;;  %vm4953_vm2 = vmor %vm1936_vm0, %vm1937_vm1  ;;  %s3825_s29 = sshll.u32 %s4305_s30, 6  ;;  %vm3439_vm3 = vcmask 125952  }
 0x137   : > { %s5293_s10 = scalar_lea.vmem %s4410_s21, %s3825_s29 }
 0x139   : > { %v4766_v35 = vld [vmem:[%s4763_s24] sm:$0xf]  ;;  %v4769_v43 = vld [vmem:[%s4763_s24 + $0x4] sm:$0xf]  ;;  %v4772_v26 = vld [vmem:[%s4763_s24 + $0x8] sm:$0x1] }
 0x13a   : > { %v1421_v44 = vshrl.u32 %v4766_v35, 16  ;;  %v1424_v45 = vshll.u32 %v4766_v35, 16  ;;  %v1430_v46 = vshll.u32 %v4769_v43, 16  ;;  %v1434_v19 = vshrl.u32 %v4769_v43, 16  ;;  %v4782_v37 = vld [vmem:[%s4763_s24 + $0x30] sm:$0xf] }
 0x13b   : > { %v1440_v47 = vshll.u32 %v4772_v26, 16  ;;  %v4786_v48 = vld [vmem:[%s4763_s24 + $0x34] sm:$0xf]  ;;  %v4789_v49 = vld [vmem:[%s4763_s24 + $0x38] sm:$0x1]  ;;  %v1517_v55 = vshrl.u32 %v4782_v37, 16 }
 0x13c   : > { %v1423_v50 = vrot.slane %v1421_v44, 4  ;;  %v1426_v51 = vrot.slane %v1424_v45, 5  ;;  %v1432_v52 = vrot.slane %v1430_v46, 5  ;;  %v1436_v53 = vrot.slane %v1434_v19, 4  ;;  %v4797_v62 = vld [vmem:[%s4763_s24 + $0xc] sm:$0xf] }
 0x13d   : > { %v1442_v54 = vrot.slane %v1440_v47, 5  ;;  %v1520_v56 = vshll.u32 %v4782_v37, 16  ;;  %v1526_v57 = vshll.u32 %v4786_v48, 16  ;;  %v1530_v60 = vshrl.u32 %v4786_v48, 16  ;;  %v4800_v0 = vld [vmem:[%s4763_s24 + $0x10] sm:$0xf] }
 0x13e   : > { %v1427_v58 = vor.u32 %v1426_v51, %v1423_v50  ;;  %v1437_v59 = vor.u32 %v1436_v53, %v1432_v52  ;;  %v1536_v61 = vshll.u32 %v4789_v49, 16  ;;  %v1519_v2 = vrot.slane %v1517_v55, 4  ;;  %v4812_v12 = vld [vmem:[%s4763_s24 + $0x14] sm:$0x1]  ;;  %v4823_v30 = vld [vmem:[%s4763_s24 + $0x3c] sm:$0xf] }
 0x13f   : > { %v1522_v3 = vrot.slane %v1520_v56, 5  ;;  %v1528_v4 = vrot.slane %v1526_v57, 5  ;;  %v1532_v9 = vrot.slane %v1530_v60, 4  ;;  %v1445_v14 = vshrl.u32 %v4797_v62, 16  ;;  %v4827_v38 = vld [vmem:[%s4763_s24 + $0x40] sm:$0xf] }
 0x140   : > { %v1428_v6 = vrot.slane %v1427_v58, 4  ;;  %v1438_v7 = vrot.slane %v1437_v59, 4  ;;  %v1538_v10 = vrot.slane %v1536_v61, 5  ;;  %v1448_v17 = vshll.u32 %v4797_v62, 16  ;;  %v4835_v8 = vld [vmem:[%s4763_s24 + $0x44] sm:$0x1] }
 0x141   : > { %v1523_v11 = vor.u32 %v1522_v3, %v1519_v2  ;;  %v1454_v15 = vshll.u32 %v4800_v0, 16  ;;  %v1533_v21 = vor.u32 %v1532_v9, %v1528_v4  ;;  %v1458_v23 = vshrl.u32 %v4800_v0, 16  ;;  %v4845_v19 = vld [vmem:[%s4763_s24 + $0x18] sm:$0xf]  ;;  %v4850_v53 = vld [vmem:[%s4763_s24 + $0x1c] sm:$0xf] }
 0x142   : > { %v1433_v31 = vsel %vm4804_vm15, %v1428_v6, %v1432_v52  ;;  %v1443_v63 = vsel %vm4804_vm15, %v1438_v7, %v1442_v54  ;;  %v1447_v28 = vrot.slane %v1445_v14, 4  ;;  %v1450_v29 = vrot.slane %v1448_v17, 5  ;;  %v4859_v58 = vld [vmem:[%s4763_s24 + $0x20] sm:$0x1]  ;;  %v4865_v3 = vld [vmem:[%s4763_s24 + $0x48] sm:$0xf] }
 0x143   : > { %v3624_v24 = vcombine.low %v1433_v31, %v1443_v63  ;;  %v1524_v25 = vrot.slane %v1523_v11, 4  ;;  %v1534_v32 = vrot.slane %v1533_v21, 4  ;;  %v1456_v33 = vrot.slane %v1454_v15, 5  ;;  %v4879_v15 = vld [vmem:[%s5640_s3 + $0x8] sm:$0x3] }
 0x144   : > { %v1460_v34 = vrot.slane %v1458_v23, 4  ;;  %v1464_v36 = vshll.u32 %v4812_v12, 16  ;;  %v1944_v39 = vrot.slane %v4772_v26, 5  ;;  %v1451_v22 = vor.u32 %v1450_v29, %v1447_v28  ;;  %v4885_v29 = vld [vmem:[%s4763_s24 + $0x50] sm:$0x1] }
 0x145   : > { %3994 = vmatprep.mubr.msk.bf16.mxu0 %vm1638_vm14, %v3624_v24  ;;  %v1529_v40 = vsel %vm4804_vm15, %v1524_v25, %v1528_v4  ;;  %v1948_v41 = vrot.slane %v4800_v0, 5  ;;  %v1539_v20 = vsel %vm4804_vm15, %v1534_v32, %v1538_v10  ;;  %v1541_v27 = vshrl.u32 %v4823_v30, 16 }
 0x146   : > { %v1461_v18 = vor.u32 %v1460_v34, %v1456_v33  ;;  %v1466_v13 = vrot.slane %v1464_v36, 5  ;;  %v4840_v16 = vcombine.low %v1529_v40, %v1539_v20  ;;  %v1452_v44 = vrot.slane %v1451_v22, 4  ;;  %v4892_v22 = vld [vmem:[%s4763_s24 + $0x24] sm:$0xf] }
 0x147   : > { %v1544_v45 = vshll.u32 %v4823_v30, 16  ;;  %v1550_v46 = vshll.u32 %v4827_v38, 16  ;;  %v1543_v50 = vrot.slane %v1541_v27, 4  ;;  %v1554_v51 = vshrl.u32 %v4827_v38, 16 }
 0x148   : > { %v1462_v47 = vrot.slane %v1461_v18, 4  ;;  %v1560_v52 = vshll.u32 %v4835_v8, 16  ;;  %4002 = vmatprep.mubr.msk.bf16.mxu1 %vm1638_vm14, %v4840_v16  ;;  %v1457_v54 = vsel %vm4804_vm15, %v1452_v44, %v1456_v33  ;;  %v2046_v57 = vsel %vm1663_vm11, %v4761_v42, 0  ;;  %v4872_v42 = vld [vmem:[%s4763_s24 + $0x4c] sm:$0xf] }
 0x149   : > { %v1546_v55 = vrot.slane %v1544_v45, 5  ;;  %v1552_v56 = vrot.slane %v1550_v46, 5  ;;  %v1556_v60 = vrot.slane %v1554_v51, 4  ;;  %v1469_v2 = vshrl.u32 %v4845_v19, 16  ;;  %v4900_v44 = vld [vmem:[%s4763_s24 + $0x28] sm:$0xf] }
 0x14a   : > { %v1467_v59 = vsel %vm4804_vm15, %v1462_v47, %v1466_v13  ;;  %v1562_v61 = vrot.slane %v1560_v52, 5  ;;  %v1472_v7 = vshll.u32 %v4845_v19, 16  ;;  %v1478_v9 = vshll.u32 %v4850_v53, 16  ;;  %v4906_v51 = vld [vmem:[%s4763_s24 + $0x2c] sm:$0x1] }
 0x14b   : > { %v4867_v4 = vcombine.low %v1457_v54, %v1467_v59  ;;  %v1547_v6 = vor.u32 %v1546_v55, %v1543_v50  ;;  %v1557_v10 = vor.u32 %v1556_v60, %v1552_v56  ;;  %v1471_v11 = vrot.slane %v1469_v2, 4 }
 0x14c   : > { %v1482_v14 = vshrl.u32 %v4850_v53, 16  ;;  %v1488_v17 = vshll.u32 %v4859_v58, 16  ;;  %v1474_v63 = vrot.slane %v1472_v7, 5  ;;  %v1480_v21 = vrot.slane %v1478_v9, 5 }
 0x14d   : > { %3995 = vmatmul.mubr.msk.bf16.vlgmr.msra.gmra.mxu0 %vm1638_vm14, %v4867_v4  ;;  %v1548_v31 = vrot.slane %v1547_v6, 4  ;;  %v1565_v23 = vshrl.u32 %v4865_v3, 16  ;;  %v1558_v24 = vrot.slane %v1557_v10, 4  ;;  %v1568_v32 = vshll.u32 %v4865_v3, 16  ;;  %v4921_v6 = vld [vmem:[%s4763_s24 + $0x54] sm:$0xf] }
 0x14e   : > { %4029 = vmatpush3.bf16.msra.mxu0 %v2046_v57  ;;  %v1484_v25 = vrot.slane %v1482_v14, 4  ;;  %v1490_v28 = vrot.slane %v1488_v17, 5  ;;  %v1475_v34 = vor.u32 %v1474_v63, %v1471_v11  ;;  %v1574_v40 = vshll.u32 %v4872_v42, 16  ;;  %v4912_v57 = vld [vmem:[%s5640_s3 + $0x6] sm:$0x3] }
 0x14f   : > { %v1553_v33 = vsel %vm4804_vm15, %v1548_v31, %v1552_v56  ;;  %v1567_v36 = vrot.slane %v1565_v23, 4  ;;  %4201 = vmatprep.subr.msk.bf16.mxu0 %vm1663_vm11, %v4879_v15  ;;  %v1563_v20 = vsel %vm4804_vm15, %v1558_v24, %v1562_v61  ;;  %v1570_v13 = vrot.slane %v1568_v32, 5  ;;  %v4927_v14 = vld [vmem:[%s4763_s24 + $0x58] sm:$0xf] }
 0x150   : > { %v1485_v18 = vor.u32 %v1484_v25, %v1480_v21  ;;  %v1578_v27 = vshrl.u32 %v4872_v42, 16  ;;  %v4902_v45 = vcombine.low %v1553_v33, %v1563_v20  ;;  %v1476_v46 = vrot.slane %v1475_v34, 4  ;;  %v4941_v33 = vld [vmem:[%s4763_s24 + $0x5c] sm:$0x1] }
 0x151   : > { %v1576_v47 = vrot.slane %v1574_v40, 5  ;;  %v1584_v50 = vshll.u32 %v4885_v29, 16  ;;  %v1571_v54 = vor.u32 %v1570_v13, %v1567_v36  ;;  %v1493_v56 = vshrl.u32 %v4892_v22, 16 }
 0x152   : > { %v1486_v52 = vrot.slane %v1485_v18, 4  ;;  %v1580_v55 = vrot.slane %v1578_v27, 4  ;;  %4003 = vmatmul.mubr.msk.bf16.vlgmr.msra.gmra.mxu1 %vm1638_vm14, %v4902_v45  ;;  %v1481_v59 = vsel %vm4804_vm15, %v1476_v46, %v1480_v21  ;;  %v1496_v61 = vshll.u32 %v4892_v22, 16 }
 0x153   : > { %v1586_v60 = vrot.slane %v1584_v50, 5  ;;  %v1502_v2 = vshll.u32 %v4900_v44, 16  ;;  %4011 = vmatpush3.bf16.msra.mxu1 %v4809_v5  ;;  %v1572_v9 = vrot.slane %v1571_v54, 4  ;;  %v1495_v11 = vrot.slane %v1493_v56, 4  ;;  %v3733_v56 = vld [vmem:[%s5640_s3 + $0x10] sm:$0x3] }
 0x154   : > { %v1491_v7 = vsel %vm4804_vm15, %v1486_v52, %v1490_v28  ;;  %v1581_v10 = vor.u32 %v1580_v55, %v1576_v47  ;;  %v1498_v31 = vrot.slane %v1496_v61, 5  ;;  %v1506_v21 = vshrl.u32 %v4900_v44, 16  ;;  %4200 = vmatprep.subr.msk.bf16.mxu1 %vm1663_vm11, %v4912_v57 }
 0x155   : > { %v4929_v17 = vcombine.low %v1481_v59, %v1491_v7  ;;  %v1504_v63 = vrot.slane %v1502_v2, 5  ;;  %v1577_v5 = vsel %vm4804_vm15, %v1572_v9, %v1576_v47  ;;  %v1512_v24 = vshll.u32 %v4906_v51, 16 }
 0x156   : > { %v1582_v23 = vrot.slane %v1581_v10, 4  ;;  %v1589_v25 = vshrl.u32 %v4921_v6, 16  ;;  %v1499_v28 = vor.u32 %v1498_v31, %v1495_v11  ;;  %v1508_v32 = vrot.slane %v1506_v21, 4 }
 0x157   : > { %3998 = vmatprep.mubr.msk.bf16.mxu0 %vm1638_vm14, %v4929_v17  ;;  %v1592_v34 = vshll.u32 %v4921_v6, 16  ;;  %v1598_v36 = vshll.u32 %v4927_v14, 16  ;;  %v1514_v20 = vrot.slane %v1512_v24, 5  ;;  %v1602_v13 = vshrl.u32 %v4927_v14, 16 }
 0x158   : > { %v1587_v40 = vsel %vm4804_vm15, %v1582_v23, %v1586_v60  ;;  %v1591_v18 = vrot.slane %v1589_v25, 4  ;;  %v1500_v46 = vrot.slane %v1499_v28, 4  ;;  %v1509_v47 = vor.u32 %v1508_v32, %v1504_v63 }
 0x159   : > { %v4948_v27 = vcombine.low %v1577_v5, %v1587_v40  ;;  %v1594_v50 = vrot.slane %v1592_v34, 5  ;;  %v1600_v52 = vrot.slane %v1598_v36, 5  ;;  %v1604_v54 = vrot.slane %v1602_v13, 4 }
 0x15a   : > { %v1608_v55 = vshll.u32 %v4941_v33, 16  ;;  %v3656_v59 = vrot.slane %v4766_v35, 9  ;;  %v1505_v60 = vsel %vm4804_vm15, %v1500_v46, %v1504_v63  ;;  %v1510_v61 = vrot.slane %v1509_v47, 4 }
 0x15b   : > { %4006 = vmatprep.mubr.msk.bf16.mxu1 %vm1638_vm14, %v4948_v27  ;;  %v1595_v2 = vor.u32 %v1594_v50, %v1591_v18  ;;  %v1941_v7 = vrot.slane %v4769_v43, 5  ;;  %v1951_v9 = vrot.slane %v4812_v12, 5  ;;  %v1605_v10 = vor.u32 %v1604_v54, %v1600_v52 }
 0x15c   : > { %v1610_v11 = vrot.slane %v1608_v55, 5  ;;  %v3657_v31 = vrot.slane %v4797_v62, 9  ;;  %v1515_v21 = vsel %vm4804_vm15, %v1510_v61, %v1514_v20  ;;  %v1950_v28 = vrot.slane %v1948_v41, 4 }
 0x15d   : > { %v1596_v5 = vrot.slane %v1595_v2, 4  ;;  %v1942_v23 = vsel %vm4953_vm2, %v3656_v59, %v1941_v7  ;;  %v1943_v24 = vrot.slane %v1941_v7, 4  ;;  %v4969_v25 = vcombine.low %v1505_v60, %v1515_v21 }
 0x15e   : > { %v1606_v63 = vrot.slane %v1605_v10, 4  ;;  %v3640_v36 = vcombine.low %v4766_v35, %v4769_v43  ;;  %v1949_v20 = vsel %vm4953_vm2, %v3657_v31, %v1948_v41  ;;  %v1952_v26 = vsel %vm4953_vm2, %v1950_v28, %v1951_v9  ;;  %v5059_v28 = vld [vmem:[%s5640_s3 + $0xa] sm:$0x3] }
 0x15f   : > { %v1601_v12 = vsel %vm4804_vm15, %v1596_v5, %v1600_v52  ;;  %v1945_v32 = vsel %vm4953_vm2, %v1943_v24, %v1944_v39  ;;  %3999 = vmatmul.mubr.msk.bf16.gmra.mxu0 %vm1638_vm14, %v4969_v25  ;;  %v3658_v39 = vrot.slane %v4845_v19, 9  ;;  %v1955_v13 = vrot.slane %v4850_v53, 5 }
 0x160   : > { %v1611_v34 = vsel %vm4804_vm15, %v1606_v63, %v1610_v11  ;;  %v3665_v40 = vcombine.low %v1942_v23, %v1945_v32  ;;  %v1958_v46 = vrot.slane %v4859_v58, 5  ;;  %v1962_v35 = vrot.slane %v4900_v44, 5  ;;  %v5046_v23 = vld [vmem:[%s4763_s24 + $0x60] sm:$0xf] }
 0x161   : > { %v4989_v18 = vcombine.low %v1601_v12, %v1611_v34  ;;  %v1956_v43 = vsel %vm4953_vm2, %v3658_v39, %v1955_v13  ;;  %v1957_v41 = vrot.slane %v1955_v13, 4  ;;  %v3659_v47 = vrot.slane %v4892_v22, 9  ;;  %v1412_v34 = vld [vmem:[%s4763_s24 + $0x68] sm:$0x1] }
 0x162   : > { %4030 = vmatprep.mubr.msk.bf16.mxu0 %vm1638_vm14, %v3665_v40  ;;  %v5004_v50 = vcombine.low %v1949_v20, %v1952_v26  ;;  %v1964_v52 = vrot.slane %v1962_v35, 4  ;;  %v1965_v54 = vrot.slane %v4906_v51, 5  ;;  %v1969_v58 = vrot.slane %v4786_v48, 5 }
 0x163   : > { %4007 = vmatmul.mubr.msk.bf16.gmra.mxu1 %vm1638_vm14, %v4989_v18  ;;  %v1972_v55 = vrot.slane %v4789_v49, 5  ;;  %v1959_v59 = vsel %vm4953_vm2, %v1957_v41, %v1958_v46  ;;  %v1976_v60 = vrot.slane %v4827_v38, 5  ;;  %v2320_v61 = vsel %vm1663_vm11, %v4879_v15, 0  ;;  %v5031_v15 = vld [vmem:[%s5640_s3 + $0xc] sm:$0x3] }
 0x164   : > { %4012 = vmatprep.mubr.msk.bf16.mxu1 %vm1638_vm14, %v3640_v36  ;;  %v5014_v2 = vcombine.low %v1956_v43, %v1959_v59  ;;  %v3660_v7 = vrot.slane %v4782_v37, 9  ;;  %v1971_v9 = vrot.slane %v1969_v58, 4  ;;  %v5019_v51 = vcombine.low %v4797_v62, %v4800_v0 }
 0x165   : > { %v5023_v49 = vcombine.low %v4845_v19, %v4850_v53  ;;  %v1963_v10 = vsel %vm4953_vm2, %v3659_v47, %v1962_v35  ;;  %v3661_v11 = vrot.slane %v4823_v30, 9  ;;  %v1966_v62 = vsel %vm4953_vm2, %v1964_v52, %v1965_v54 }
 0x166   : > { %v1978_v0 = vrot.slane %v1976_v60, 4  ;;  %v1979_v19 = vrot.slane %v4835_v8, 5  ;;  %v1983_v53 = vrot.slane %v4872_v42, 5  ;;  %v2172_v31 = vsel %vm1663_vm11, %v4912_v57, 0 }
 0x167   : > { %4031 = vmatmul.mubr.msk.bf16.vlgmr.msra.gmra.mxu0 %vm1638_vm14, %v5004_v50  ;;  %v3662_v21 = vrot.slane %v4865_v3, 9  ;;  %v1986_v5 = vrot.slane %v4885_v29, 5  ;;  %v5050_v24 = vcombine.low %v4892_v22, %v4900_v44  ;;  %v1970_v8 = vsel %vm4953_vm2, %v3660_v7, %v1969_v58  ;;  %v5064_v29 = vld [vmem:[%s4763_s24 + $0x64] sm:$0xf] }
 0x168   : > { %4065 = vmatpush3.bf16.msra.mxu0 %v2320_v61  ;;  %4034 = vmatprep.mubr.msk.bf16.mxu0 %vm1638_vm14, %v5014_v2  ;;  %v1973_v57 = vsel %vm4953_vm2, %v1971_v9, %v1972_v55  ;;  %v1985_v63 = vrot.slane %v1983_v53, 4  ;;  %v5068_v22 = vcombine.low %v1963_v10, %v1966_v62  ;;  %v5072_v44 = vcombine.low %v4782_v37, %v4786_v48  ;;  %v5114_v10 = vld [vmem:[%s4763_s24 + $0x70] sm:$0xf] }
 0x169   : > { %4203 = vmatprep.subr.msk.bf16.mxu0 %vm1663_vm11, %v5031_v15  ;;  %v5076_v12 = vcombine.low %v4823_v30, %v4827_v38  ;;  %v1977_v32 = vsel %vm4953_vm2, %v3661_v11, %v1976_v60  ;;  %v1980_v36 = vsel %vm4953_vm2, %v1978_v0, %v1979_v19  ;;  %v1990_v40 = vrot.slane %v4927_v14, 5  ;;  %v5107_v60 = vld [vmem:[%s4763_s24 + $0x6c] sm:$0xf] }
 0x16a   : > { %v2288_v37 = vshrl.u32 %v5046_v23, 16  ;;  %v2291_v48 = vshll.u32 %v5046_v23, 16  ;;  %v5088_v20 = vcombine.low %v1970_v8, %v1973_v57  ;;  %v1984_v30 = vsel %vm4953_vm2, %v3662_v21, %v1983_v53  ;;  %v1415_v53 = vld [vmem:[%s4763_s24 + $0x74] sm:$0x1] }
 0x16b   : > { %4013 = vmatmul.mubr.msk.bf16.vlgmr.msra.gmra.mxu1 %vm1638_vm14, %v5019_v51  ;;  %v1987_v38 = vsel %vm4953_vm2, %v1985_v63, %v1986_v5  ;;  %v2301_v26 = vshrl.u32 %v5064_v29, 16  ;;  %v2297_v46 = vshll.u32 %v5064_v29, 16  ;;  %v2307_v35 = vshll.u32 %v1412_v34, 16 }
 0x16c   : > { %4047 = vmatpush3.bf16.msra.mxu1 %v2172_v31  ;;  %4016 = vmatprep.mubr.msk.bf16.mxu1 %vm1638_vm14, %v5023_v49  ;;  %v2290_v39 = vrot.slane %v2288_v37, 4  ;;  %v2293_v13 = vrot.slane %v2291_v48, 5  ;;  %v5098_v43 = vcombine.low %v1977_v32, %v1980_v36  ;;  %v3663_v41 = vrot.slane %v4921_v6, 9 }
 0x16d   : > { %4202 = vmatprep.subr.msk.bf16.mxu1 %vm1663_vm11, %v5059_v28  ;;  %v1993_v47 = vrot.slane %v4941_v33, 5  ;;  %v2303_v52 = vrot.slane %v2301_v26, 4  ;;  %v5104_v54 = vcombine.low %v1984_v30, %v1987_v38  ;;  %v1992_v58 = vrot.slane %v1990_v40, 4 }
 0x16e   : > { %v2294_v55 = vor.u32 %v2293_v13, %v2290_v39  ;;  %v2299_v59 = vrot.slane %v2297_v46, 5  ;;  %v2309_v61 = vrot.slane %v2307_v35, 5  ;;  %v3701_v7 = vrot.slane %v5046_v23, 9 }
 0x16f   : > { %4035 = vmatmul.mubr.msk.bf16.gmra.mxu0 %vm1638_vm14, %v5068_v22  ;;  %v2438_v33 = vrot.slane %v5064_v29, 5  ;;  %v2441_v9 = vrot.slane %v1412_v34, 5  ;;  %v2694_v0 = vshrl.u32 %v5107_v60, 16  ;;  %v2697_v19 = vshll.u32 %v5107_v60, 16 }
 0x170   : > { %4038 = vmatprep.mubr.msk.bf16.mxu0 %vm1638_vm14, %v5088_v20  ;;  %v2295_v11 = vrot.slane %v2294_v55, 4  ;;  %v2304_v62 = vor.u32 %v2303_v52, %v2299_v59  ;;  %v2707_v5 = vshrl.u32 %v5114_v10, 16  ;;  %v2703_v8 = vshll.u32 %v5114_v10, 16 }
 0x171   : > { %v2439_v31 = vsel %vm4953_vm2, %v3701_v7, %v2438_v33  ;;  %v2440_v21 = vrot.slane %v2438_v33, 4  ;;  %v2696_v32 = vrot.slane %v2694_v0, 4  ;;  %v2699_v34 = vrot.slane %v2697_v19, 5 }
 0x172   : > { %v2300_v57 = vsel %vm4804_vm15, %v2295_v11, %v2299_v59  ;;  %v2305_v63 = vrot.slane %v2304_v62, 4  ;;  %v2705_v37 = vrot.slane %v2703_v8, 5  ;;  %v2709_v48 = vrot.slane %v2707_v5, 4  ;;  %v4280_v5 = vld [vmem:[%s5293_s10 + $0x28] sm:$0xff]  }
 0x173   : > { %4017 = vmatmul.mubr.msk.bf16.gmra.mxu1 %vm1638_vm14, %v5050_v24  ;;  %v2442_v36 = vsel %vm4953_vm2, %v2440_v21, %v2441_v9  ;;  %v2713_v30 = vshll.u32 %v1415_v53, 16  ;;  %v2700_v39 = vor.u32 %v2699_v34, %v2696_v32  ;;  %v3732_v13 = vrot.slane %v5107_v60, 9 }
 0x174   : > { %4020 = vmatprep.mubr.msk.bf16.mxu1 %vm1638_vm14, %v5072_v44  ;;  %v2310_v38 = vsel %vm4804_vm15, %v2305_v63, %v2309_v61  ;;  %v5133_v26 = vcombine.low %v2439_v31, %v2442_v36  ;;  %v2710_v35 = vor.u32 %v2709_v48, %v2705_v37  ;;  %v2844_v55 = vrot.slane %v5114_v10, 5  ;;  %v4279_v31 = vld [vmem:[%s5293_s10 + $0x20] sm:$0xff]  }
 0x175   : > { %v5136_v46 = vcombine.low %v2300_v57, %v2310_v38  ;;  %v2715_v52 = vrot.slane %v2713_v30, 5  ;;  %v3646_v59 = vcombine.low %v4865_v3, %v4872_v42  ;;  %v1991_v61 = vsel %vm4953_vm2, %v3663_v41, %v1990_v40  ;;  %v4281_v30 = vld [vmem:[%s5293_s10 + $0x30] sm:$0xff]  }
 0x176   : > { %v2701_v7 = vrot.slane %v2700_v39, 4  ;;  %v2847_v33 = vrot.slane %v1415_v53, 5  ;;  %v1994_v9 = vsel %vm4953_vm2, %v1992_v58, %v1993_v47  ;;  %v2711_v11 = vrot.slane %v2710_v35, 4 }
 0x177   : > { %4039 = vmatmul.mubr.msk.bf16.gmra.mxu0 %vm1638_vm14, %v5098_v43  ;;  %v5151_v62 = vsel %vm4953_vm2, %v3732_v13, %v2844_v55  ;;  %v2846_v0 = vrot.slane %v2844_v55, 4  ;;  %v3672_v41 = vcombine.low %v1991_v61, %v1994_v9  ;;  %v3647_v19 = vcombine.low %v4921_v6, %v4927_v14  ;;  %v4282_v13 = vld [vmem:[%s5293_s10 + $0x38] sm:$0xff]  }
 0x178   : > { %4042 = vmatprep.mubr.msk.bf16.mxu0 %vm1638_vm14, %v5104_v54  ;;  %v2706_v3 = vsel %vm4804_vm15, %v2701_v7, %v2705_v37  ;;  %v2716_v42 = vsel %vm4804_vm15, %v2711_v11, %v2715_v52  ;;  %v2578_v1 = vsel %vm1663_vm11, %v5031_v15, 0  ;;  %v2452_v6 = vsel %vm1663_vm11, %v5059_v28, 0 }
 0x179   : > { %v5161_v40 = vsel %vm4953_vm2, %v2846_v0, %v2847_v33  ;;  %v5164_v47 = vcombine.low %v2706_v3, %v2716_v42  ;;  %v3682_v14 = vcombine.low %v5046_v23, %v5064_v29  ;;  %v4276_v23 = vld [vmem:[%s5293_s10 + $0x8] sm:$0xff]  }
 0x17a   : > { %v3734_v58 = vcombine.low %v5151_v62, %v5161_v40 }
 0x17b   : > { %4021 = vmatmul.mubr.msk.bf16.gmra.mxu1 %vm1638_vm14, %v5076_v12 }
 0x17c   : > { %4024 = vmatprep.mubr.msk.bf16.mxu1 %vm1638_vm14, %v3646_v59 }
 0x17f   : > { %4043 = vmatmul.mubr.msk.bf16.gmra.mxu0 %vm1638_vm14, %v3672_v41 }
 0x180   : > { %4066 = vmatprep.mubr.msk.bf16.mxu0 %vm1638_vm14, %v4867_v4  ;;  %v3722_v4 = vld [vmem:[%s5640_s3 + $0xe] sm:$0x3] }
 0x181   : > { %v2726_v15 = vsel %vm1663_vm11, %v3722_v4, 0 }
 0x183   : > { %4025 = vmatmul.mubr.msk.bf16.gmra.mxu1 %vm1638_vm14, %v3647_v19 }
 0x184   : > { %4048 = vmatprep.mubr.msk.bf16.mxu1 %vm1638_vm14, %v5019_v51  ;;  %v2858_v51 = vsel %vm1663_vm11, %v3733_v56, 0 }
 0x187   : > { %4067 = vmatmul.mubr.msk.bf16.vlgmr.msra.gmra.mxu0 %vm1638_vm14, %v4929_v17 }
 0x188   : > { %4101 = vmatpush3.bf16.msra.mxu0 %v2578_v1  ;;  %4070 = vmatprep.mubr.msk.bf16.mxu0 %vm1638_vm14, %v4969_v25 }
 0x189   : > { %4205 = vmatprep.subr.msk.bf16.mxu0 %vm1663_vm11, %v3733_v56 }
 0x18b   : > { %4049 = vmatmul.mubr.msk.bf16.vlgmr.msra.gmra.mxu1 %vm1638_vm14, %v5023_v49 }
 0x18c   : > { %4083 = vmatpush3.bf16.msra.mxu1 %v2452_v6  ;;  %4052 = vmatprep.mubr.msk.bf16.mxu1 %vm1638_vm14, %v5050_v24 }
 0x18d   : > { %4204 = vmatprep.subr.msk.bf16.mxu1 %vm1663_vm11, %v3722_v4 }
 0x18f   : > { %4071 = vmatmul.mubr.msk.bf16.gmra.mxu0 %vm1638_vm14, %v4840_v16 }
 0x190   : > { %4074 = vmatprep.mubr.msk.bf16.mxu0 %vm1638_vm14, %v4902_v45 }
 0x193   : > { %4053 = vmatmul.mubr.msk.bf16.gmra.mxu1 %vm1638_vm14, %v5072_v44 }
 0x194   : > { %4056 = vmatprep.mubr.msk.bf16.mxu1 %vm1638_vm14, %v5076_v12 }
 0x197   : > { %4075 = vmatmul.mubr.msk.bf16.gmra.mxu0 %vm1638_vm14, %v4948_v27 }
 0x198   : > { %4078 = vmatprep.mubr.msk.bf16.mxu0 %vm1638_vm14, %v4989_v18 }
 0x19b   : > { %4057 = vmatmul.mubr.msk.bf16.gmra.mxu1 %vm1638_vm14, %v3646_v59 }
 0x19c   : > { %4060 = vmatprep.mubr.msk.bf16.mxu1 %vm1638_vm14, %v3647_v19 }
 0x19f   : > { %4079 = vmatmul.mubr.msk.bf16.gmra.mxu0 %vm1638_vm14, %v5136_v46 }
 0x1a0   : > { %4102 = vmatprep.mubr.msk.bf16.mxu0 %vm1638_vm14, %v5023_v49  ;;  %v4275_v49 = vld [vmem:[%s5293_s10] sm:$0xff]  }
 0x1a3   : > { %4061 = vmatmul.mubr.msk.bf16.gmra.mxu1 %vm1638_vm14, %v3682_v14 }
 0x1a4   : > { %4084 = vmatprep.mubr.msk.bf16.mxu1 %vm1638_vm14, %v5004_v50  ;;  %v3713_v50 = vcombine.low %v5107_v60, %v5114_v10 }
 0x1a7   : > { %4103 = vmatmul.mubr.msk.bf16.vlgmr.msra.gmra.mxu0 %vm1638_vm14, %v5050_v24 }
 0x1a8   : > { %4137 = vmatpush3.bf16.msra.mxu0 %v2858_v51  ;;  %4106 = vmatprep.mubr.msk.bf16.mxu0 %vm1638_vm14, %v5072_v44  ;;  %v4277_v44 = vld [vmem:[%s5293_s10 + $0x10] sm:$0xff]  }
 0x1ab   : > { %4085 = vmatmul.mubr.msk.bf16.vlgmr.msra.gmra.mxu1 %vm1638_vm14, %v5014_v2 }
 0x1ac   : > { %4119 = vmatpush3.bf16.msra.mxu1 %v2726_v15  ;;  %4088 = vmatprep.mubr.msk.bf16.mxu1 %vm1638_vm14, %v5068_v22 }
 0x1af   : > { %4107 = vmatmul.mubr.msk.bf16.gmra.mxu0 %vm1638_vm14, %v5076_v12  ;;  %v4278_v12 = vld [vmem:[%s5293_s10 + $0x18] sm:$0xff]  }
 0x1b0   : > { %4110 = vmatprep.mubr.msk.bf16.mxu0 %vm1638_vm14, %v3646_v59 }
 0x1b3   : > { %4089 = vmatmul.mubr.msk.bf16.gmra.mxu1 %vm1638_vm14, %v5088_v20 }
 0x1b4   : > { %4092 = vmatprep.mubr.msk.bf16.mxu1 %vm1638_vm14, %v5098_v43 }
 0x1b7   : > { %4111 = vmatmul.mubr.msk.bf16.gmra.mxu0 %vm1638_vm14, %v3647_v19 }
 0x1b8   : > { %4114 = vmatprep.mubr.msk.bf16.mxu0 %vm1638_vm14, %v3682_v14 }
 0x1bb   : > { %4093 = vmatmul.mubr.msk.bf16.gmra.mxu1 %vm1638_vm14, %v5104_v54 }
 0x1bc   : > { %4096 = vmatprep.mubr.msk.bf16.mxu1 %vm1638_vm14, %v3672_v41 }
 0x1bf   : > { %4115 = vmatmul.mubr.msk.bf16.gmra.mxu0 %vm1638_vm14, %v3713_v50 }
 0x1c0   : > { %4138 = vmatprep.mubr.msk.bf16.mxu0 %vm1638_vm14, %v5014_v2 }
 0x1c3   : > { %4097 = vmatmul.mubr.msk.bf16.gmra.mxu1 %vm1638_vm14, %v5133_v26 }
 0x1c4   : > { %4120 = vmatprep.mubr.msk.bf16.mxu1 %vm1638_vm14, %v4929_v17 }
 0x1c7   : > { %4139 = vmatmul.mubr.msk.bf16.vlgmr.msra.gmra.mxu0 %vm1638_vm14, %v5068_v22 }
 0x1c8   : > { %4142 = vmatprep.mubr.msk.bf16.mxu0 %vm1638_vm14, %v5088_v20 }
 0x1cb   : > { %4121 = vmatmul.mubr.msk.bf16.vlgmr.msra.gmra.mxu1 %vm1638_vm14, %v4969_v25 }
 0x1cc   : > { %4124 = vmatprep.mubr.msk.bf16.mxu1 %vm1638_vm14, %v4840_v16  ;;  %v3020_v16 = vld [vmem:[%s5642_s5] sm:$0x3] }
 0x1cd   : > { %4206 = vmatprep.subr.msk.bf16.mxu1 %vm1663_vm11, %v3020_v16  ;;  %v3053_v17 = vsel %vm1663_vm11, %v3020_v16, 0 }
 0x1ce   : > { %4155 = vmatpush3.bf16.msra.mxu1 %v3053_v17 }
 0x1cf   : > { %4143 = vmatmul.mubr.msk.bf16.gmra.mxu0 %vm1638_vm14, %v5098_v43 }
 0x1d0   : > { %4146 = vmatprep.mubr.msk.bf16.mxu0 %vm1638_vm14, %v5104_v54 }
 0x1d3   : > { %4125 = vmatmul.mubr.msk.bf16.gmra.mxu1 %vm1638_vm14, %v4902_v45  ;;  %v3171_v45 = vld [vmem:[%s5644_s7] sm:$0x3] }
 0x1d4   : > { %4128 = vmatprep.mubr.msk.bf16.mxu1 %vm1638_vm14, %v4948_v27  ;;  %4207 = vmatprep.subr.msk.bf16.mxu0 %vm1663_vm11, %v3171_v45  ;;  %v3244_v27 = vsel %vm1663_vm11, %v3171_v45, 0 }
 0x1d5   : > { %4173 = vmatpush3.bf16.msra.mxu0 %v3244_v27 }
 0x1d7   : > { %4147 = vmatmul.mubr.msk.bf16.gmra.mxu0 %vm1638_vm14, %v3672_v41 }
 0x1d8   : > { %4150 = vmatprep.mubr.msk.bf16.mxu0 %vm1638_vm14, %v5133_v26 }
 0x1db   : > { %4129 = vmatmul.mubr.msk.bf16.gmra.mxu1 %vm1638_vm14, %v4989_v18 }
 0x1dc   : > { %4132 = vmatprep.mubr.msk.bf16.mxu1 %vm1638_vm14, %v5136_v46 }
 0x1df   : > { %4151 = vmatmul.mubr.msk.bf16.gmra.mxu0 %vm1638_vm14, %v3734_v58 }
 0x1e0   : > { %4174 = vmatprep.mubr.msk.bf16.mxu0 %vm1638_vm14, %v4275_v49 }
 0x1e3   : > { %4133 = vmatmul.mubr.msk.bf16.gmra.mxu1 %vm1638_vm14, %v5164_v47 }
 0x1e7   : > { %4175 = vmatmul.mubr.msk.bf16.vlgmr.msra.gmra.mxu0 %vm1638_vm14, %v4276_v23 }
 0x1e8   : > { %4178 = vmatprep.mubr.msk.bf16.mxu0 %vm1638_vm14, %v4277_v44 }
 0x1ef   : > { %4179 = vmatmul.mubr.msk.bf16.gmra.mxu0 %vm1638_vm14, %v4278_v12 }
 0x1f0   : > { %4182 = vmatprep.mubr.msk.bf16.mxu0 %vm1638_vm14, %v4279_v31 }
 0x1f7   : > { %4183 = vmatmul.mubr.msk.bf16.gmra.mxu0 %vm1638_vm14, %v4280_v5 }
 0x1f8   : > { %4186 = vmatprep.mubr.msk.bf16.mxu0 %vm1638_vm14, %v4281_v30 }
 0x1ff   : > { %4187 = vmatmul.mubr.msk.bf16.gmra.mxu0 %vm1638_vm14, %v4282_v13 }
 0x20d   : > { %v3996_v25 = vpop.f32.mrf.mxu0 }
 0x20f   : > { %v1701_v2 = vpop.f32.mrf.mxu0 }
 0x211   : > { %v3997_v28 = vpop.f32.mrf.mxu0 }
 0x212   : > { %v5290_v18 = vpop.f32.mrf.mxu1 }
 0x213   : > { %v1704_v22 = vpop.f32.mrf.mxu0 }
 0x214   : > { %v5298_v24 = vpop.f32.mrf.mxu1 }
 0x216   : > { %v5301_v29 = vpop.f32.mrf.mxu1 }
 0x218   : > { %v5305_v20 = vpop.f32.mrf.mxu1 }
 0x21f   : > { %v4000_v43 = vpop.f32.mrf.mxu0 }
 0x221   : > { %v1717_v54 = vpop.f32.mrf.mxu0 }
 0x223   : > { %v5309_v60 = vpop.f32.mrf.mxu1  ;;  %v4001_v10 = vpop.f32.mrf.mxu0 }
 0x225   : > { %v5311_v53 = vpop.f32.mrf.mxu1  ;;  %v1720_v21 = vpop.f32.mrf.mxu0 }
 0x227   : > { %v5315_v8 = vpop.f32.mrf.mxu1  ;;  %v4032_v57 = vpop.f32.mrf.mxu0 }
 0x229   : > { %v5319_v63 = vpop.f32.mrf.mxu1  ;;  %v2082_v32 = vpop.f32.mrf.mxu0 }
 0x22b   : > { %v4014_v34 = vpop.f32.mrf.mxu1  ;;  %v4033_v37 = vpop.f32.mrf.mxu0 }
 0x22c   : > { %v1874_v36 = vadd.f32 %v4014_v34, %v3996_v25 }
 0x22d   : > { %v1865_v48 = vpop.f32.mrf.mxu1  ;;  %v2085_v39 = vpop.f32.mrf.mxu0 }
 0x22e   : > { %v5322_v38 = vadd.f32 %v4032_v57, %v1874_v36  ;;  %v1866_v26 = vadd.f32 %v1865_v48, %v1701_v2 }
 0x22f   : > { %v4015_v46 = vpop.f32.mrf.mxu1  ;;  %v4036_v55 = vpop.f32.mrf.mxu0 }
 0x230   : > { %v5326_v35 = vadd.f32 %v2082_v32, %v1866_v26  ;;  %v1877_v52 = vadd.f32 %v4015_v46, %v3997_v28 }
 0x231   : > { %v1868_v59 = vpop.f32.mrf.mxu1  ;;  %v2098_v33 = vpop.f32.mrf.mxu0 }
 0x232   : > { %v5329_v61 = vadd.f32 %v4033_v37, %v1877_v52  ;;  %v1869_v7 = vadd.f32 %v1868_v59, %v1704_v22 }
 0x233   : > { %v4018_v9 = vpop.f32.mrf.mxu1  ;;  %v4037_v0 = vpop.f32.mrf.mxu0 }
 0x234   : > { %v5331_v11 = vadd.f32 %v2085_v39, %v1869_v7  ;;  %v1890_v62 = vadd.f32 %v4018_v9, %v4000_v43 }
 0x235   : > { %v1881_v3 = vpop.f32.mrf.mxu1  ;;  %v2101_v41 = vpop.f32.mrf.mxu0 }
 0x236   : > { %v5333_v42 = vadd.f32 %v4036_v55, %v1890_v62  ;;  %v1882_v40 = vadd.f32 %v1881_v3, %v1717_v54 }
 0x237   : > { %v4019_v47 = vpop.f32.mrf.mxu1  ;;  %v4040_v1 = vpop.f32.mrf.mxu0 }
 0x238   : > { %v5335_v58 = vadd.f32 %v2098_v33, %v1882_v40  ;;  %v1893_v19 = vadd.f32 %v4019_v47, %v4001_v10 }
 0x239   : > { %v1884_v56 = vpop.f32.mrf.mxu1  ;;  %v2114_v14 = vpop.f32.mrf.mxu0 }
 0x23a   : > { %v5337_v6 = vadd.f32 %v4037_v0, %v1893_v19  ;;  %v1885_v4 = vadd.f32 %v1884_v56, %v1720_v21 }
 0x23b   : > { %v4022_v51 = vpop.f32.mrf.mxu1  ;;  %v4041_v16 = vpop.f32.mrf.mxu0 }
 0x23c   : > { %v5339_v15 = vadd.f32 %v2101_v41, %v1885_v4  ;;  %v1906_v50 = vadd.f32 %v4022_v51, %v5290_v18 }
 0x23d   : > { %v1897_v45 = vpop.f32.mrf.mxu1  ;;  %v2117_v25 = vpop.f32.mrf.mxu0 }
 0x23e   : > { %v2155_v17 = vadd.f32 %v4040_v1, %v1906_v50  ;;  %v1898_v27 = vadd.f32 %v1897_v45, %v5298_v24 }
 0x23f   : > { %v4023_v2 = vpop.f32.mrf.mxu1  ;;  %v4044_v28 = vpop.f32.mrf.mxu0 }
 0x240   : > { %v5343_v49 = vadd.f32 %v2114_v14, %v1898_v27  ;;  %v1909_v23 = vadd.f32 %v4023_v2, %v5301_v29 }
 0x241   : > { %v1900_v22 = vpop.f32.mrf.mxu1  ;;  %v2130_v43 = vpop.f32.mrf.mxu0 }
 0x242   : > { %v5346_v44 = vadd.f32 %v4041_v16, %v1909_v23  ;;  %v1901_v12 = vadd.f32 %v1900_v22, %v5305_v20 }
 0x243   : > { %v4026_v54 = vpop.f32.mrf.mxu1  ;;  %v4045_v31 = vpop.f32.mrf.mxu0 }
 0x244   : > { %v5349_v18 = vadd.f32 %v2117_v25, %v1901_v12  ;;  %v1922_v10 = vadd.f32 %v4026_v54, %v5309_v60 }
 0x245   : > { %v1913_v24 = vpop.f32.mrf.mxu1  ;;  %v2133_v57 = vpop.f32.mrf.mxu0 }
 0x246   : > { %v2159_v21 = vadd.f32 %v4044_v28, %v1922_v10  ;;  %v1914_v5 = vadd.f32 %v1913_v24, %v5311_v53 }
 0x247   : > { %v4027_v32 = vpop.f32.mrf.mxu1  ;;  %v5356_v36 = vpop.f32.mrf.mxu0 }
 0x248   : > { %v5353_v29 = vadd.f32 %v2130_v43, %v1914_v5  ;;  %v1925_v34 = vadd.f32 %v4027_v32, %v5315_v8 }
 0x249   : > { %v1916_v20 = vpop.f32.mrf.mxu1  ;;  %v5361_v30 = vpop.f32.mrf.mxu0 }
 0x24a   : > { %v5358_v37 = vadd.f32 %v4045_v31, %v1925_v34  ;;  %v1917_v48 = vadd.f32 %v1916_v20, %v5319_v63 }
 0x24b   : > { %v4050_v60 = vpop.f32.mrf.mxu1  ;;  %v5365_v39 = vpop.f32.mrf.mxu0 }
 0x24c   : > { %5659 = vst [vmem:[#allocation3_spill] sm:$0xff] %v5358_v37  ;;  %v5363_v26 = vadd.f32 %v2133_v57, %v1917_v48 }
 0x24d   : > { %v2208_v53 = vpop.f32.mrf.mxu1  ;;  %v5367_v13 = vpop.f32.mrf.mxu0 }
 0x24e   : > { %5660 = vst [vmem:[#allocation4_spill] sm:$0xff] %v5363_v26 }
 0x24f   : > { %v4051_v46 = vpop.f32.mrf.mxu1  ;;  %v5369_v52 = vpop.f32.mrf.mxu0 }
 0x251   : > { %v2211_v8 = vpop.f32.mrf.mxu1  ;;  %v5371_v55 = vpop.f32.mrf.mxu0 }
 0x253   : > { %v5373_v59 = vpop.f32.mrf.mxu1  ;;  %v5375_v7 = vpop.f32.mrf.mxu0 }
 0x255   : > { %v5377_v63 = vpop.f32.mrf.mxu1  ;;  %v5379_v33 = vpop.f32.mrf.mxu0 }
 0x257   : > { %v5381_v9 = vpop.f32.mrf.mxu1  ;;  %v4076_v62 = vpop.f32.mrf.mxu0 }
 0x259   : > { %v5383_v0 = vpop.f32.mrf.mxu1  ;;  %v5385_v3 = vpop.f32.mrf.mxu0 }
 0x25b   : > { %v4058_v40 = vpop.f32.mrf.mxu1  ;;  %v5387_v47 = vpop.f32.mrf.mxu0 }
 0x25c   : > { %v2281_v41 = vadd.f32 %v4058_v40, %v2155_v17 }
 0x25d   : > { %v5389_v19 = vpop.f32.mrf.mxu1  ;;  %v5393_v56 = vpop.f32.mrf.mxu0 }
 0x25e   : > { %v5391_v1 = vadd.f32 %v4076_v62, %v2281_v41  ;;  %5661 = vst [vmem:[#allocation5_spill] sm:$0xff] %v5393_v56 }
 0x25f   : > { %v5395_v4 = vpop.f32.mrf.mxu1  ;;  %v4080_v14 = vpop.f32.mrf.mxu0 }
 0x261   : > { %v5397_v51 = vpop.f32.mrf.mxu1  ;;  %v5399_v50 = vpop.f32.mrf.mxu0 }
 0x262   : > { %5662 = vst [vmem:[#allocation6_spill] sm:$0xff] %v5399_v50  ;;  %v2273_v50 = vadd.f32 %v4050_v60, %v5322_v38  ;;  %v2272_v60 = vadd.f32 %v2211_v8, %v5331_v11 }
 0x263   : > { %v4062_v16 = vpop.f32.mrf.mxu1  ;;  %v5401_v27 = vpop.f32.mrf.mxu0 }
 0x264   : > { %v2285_v45 = vadd.f32 %v4062_v16, %v2159_v21  ;;  %5663 = vst [vmem:[#allocation7_spill] sm:$0xff] %v5401_v27 }
 0x265   : > { %v5403_v17 = vpop.f32.mrf.mxu1  ;;  %v5407_v2 = vpop.f32.mrf.mxu0 }
 0x266   : > { %v5405_v25 = vadd.f32 %v4080_v14, %v2285_v45  ;;  %5665 = vst [vmem:[#allocation9_spill] sm:$0xff] %v5407_v2 }
 0x267   : > { %v5409_v23 = vpop.f32.mrf.mxu1  ;;  %v4104_v28 = vpop.f32.mrf.mxu0 }
 0x268   : > { %5664 = vst [vmem:[#allocation8_spill] sm:$0xff] %v5405_v25  ;;  %5666 = vst [vmem:[#allocation10_spill] sm:$0xff] %v5409_v23  ;;  %v2271_v23 = vadd.f32 %v2208_v53, %v5326_v35 }
 0x269   : > { %v5411_v22 = vpop.f32.mrf.mxu1  ;;  %v2614_v12 = vpop.f32.mrf.mxu0 }
 0x26a   : > { %5667 = vst [vmem:[#allocation11_spill] sm:$0xff] %v5411_v22  ;;  %v2419_v38 = vadd.f32 %v5361_v30, %v2271_v23  ;;  %v2420_v30 = vadd.f32 %v5367_v13, %v2272_v60 }
 0x26b   : > { %v4086_v43 = vpop.f32.mrf.mxu1  ;;  %v4105_v54 = vpop.f32.mrf.mxu0 }
 0x26d   : > { %v2488_v10 = vpop.f32.mrf.mxu1  ;;  %v2617_v31 = vpop.f32.mrf.mxu0 }
 0x26f   : > { %v4087_v24 = vpop.f32.mrf.mxu1  ;;  %v5413_v21 = vpop.f32.mrf.mxu0 }
 0x271   : > { %v2491_v5 = vpop.f32.mrf.mxu1  ;;  %v5415_v57 = vpop.f32.mrf.mxu0 }
 0x273   : > { %v4090_v32 = vpop.f32.mrf.mxu1  ;;  %v5417_v34 = vpop.f32.mrf.mxu0 }
 0x275   : > { %v2504_v20 = vpop.f32.mrf.mxu1  ;;  %v5419_v48 = vpop.f32.mrf.mxu0 }
 0x277   : > { %v5421_v62 = vpop.f32.mrf.mxu1  ;;  %v5423_v40 = vpop.f32.mrf.mxu0 }
 0x278   : > { %5668 = vst [vmem:[#allocation12_spill] sm:$0xff] %v5423_v40  ;;  %v2274_v40 = vadd.f32 %v4051_v46, %v5329_v61  ;;  %v2275_v46 = vadd.f32 %v5377_v63, %v5335_v58  ;;  %v2276_v58 = vadd.f32 %v5383_v0, %v5339_v15  ;;  %v2279_v0 = vadd.f32 %v5389_v19, %v5343_v49 }
 0x279   : > { %v5425_v41 = vpop.f32.mrf.mxu1  ;;  %v5427_v14 = vpop.f32.mrf.mxu0 }
 0x27a   : > { %5669 = vst [vmem:[#allocation13_spill] sm:$0xff] %v5427_v14  ;;  %v2422_v53 = vadd.f32 %v5365_v39, %v2274_v40  ;;  %v2552_v39 = vadd.f32 %v2491_v5, %v2420_v30  ;;  %v2424_v15 = vadd.f32 %v5379_v33, %v2276_v58  ;;  %v2280_v30 = vadd.f32 %v5397_v51, %v5349_v18 }
 0x27b   : > { %v5429_v16 = vpop.f32.mrf.mxu1  ;;  %v5431_v45 = vpop.f32.mrf.mxu0 }
 0x27c   : > { %5670 = vst [vmem:[#allocation14_spill] sm:$0xff] %v5431_v45  ;;  %v2421_v45 = vadd.f32 %v5356_v36, %v2273_v50  ;;  %v2277_v36 = vadd.f32 %v5373_v59, %v5333_v42  ;;  %v2551_v50 = vadd.f32 %v2488_v10, %v2419_v38  ;;  %v2554_v8 = vadd.f32 %v4087_v24, %v2422_v53 }
 0x27d   : > { %v5433_v2 = vpop.f32.mrf.mxu1  ;;  %v5435_v27 = vpop.f32.mrf.mxu0  ;;  %v2423_v42 = vadd.f32 %v5371_v55, %v2275_v46  ;;  %v2278_v59 = vadd.f32 %v5381_v9, %v5337_v6  ;;  %v2678_v55 = vadd.f32 %v2617_v31, %v2552_v39  ;;  %v2556_v33 = vadd.f32 %v5425_v41, %v2424_v15 }
 0x27e   : > { %5671 = vst [vmem:[#allocation15_spill] sm:$0xff] %v5435_v27  ;;  %v2680_v13 = vadd.f32 %v4105_v54, %v2554_v8 }
 0x27f   : > { %v5437_v25 = vpop.f32.mrf.mxu1  ;;  %v5440_v22 = vpop.f32.mrf.mxu0  ;;  %v2555_v38 = vadd.f32 %v2504_v20, %v2423_v42  ;;  %v2426_v9 = vadd.f32 %v5375_v7, %v2278_v59  ;;  %v2682_v39 = vadd.f32 %v5419_v48, %v2556_v33 }
 0x280   : > { %5672 = vst [vmem:[#allocation16_spill] sm:$0xff] %v5440_v22  ;;  %v2553_v22 = vadd.f32 %v4086_v43, %v2421_v45  ;;  %v2425_v45 = vadd.f32 %v5369_v52, %v2277_v36  ;;  %v5478_v52 = vld [vmem:[%s5641_s4] ss:$0 sm:$0xff] }
 0x281   : > { %v5442_v26 = vpop.f32.mrf.mxu1  ;;  %v5445_v37 = vpop.f32.mrf.mxu0  ;;  %v2558_v7 = vadd.f32 %v5421_v62, %v2426_v9 }
 0x282   : > { %5673 = vst [vmem:[#allocation17_spill] sm:$0xff] %v5442_v26  ;;  %5674 = vst [vmem:[#allocation18_spill] sm:$0xff] %v5445_v37  ;;  %v2679_v11 = vadd.f32 %v4104_v28, %v2553_v22  ;;  %v2557_v28 = vadd.f32 %v4090_v32, %v2425_v45 }
 0x283   : > { %v5447_v14 = vpop.f32.mrf.mxu1  ;;  %v5451_v56 = vpop.f32.mrf.mxu0  ;;  %v2684_v45 = vadd.f32 %v5417_v34, %v2558_v7 }
 0x284   : > { %5675 = vst [vmem:[#allocation19_spill] sm:$0xff] %v5451_v56  ;;  %v2683_v32 = vadd.f32 %v5413_v21, %v2557_v28  ;;  %v2427_v21 = vadd.f32 %v5385_v3, %v2279_v0  ;;  %v5677_v28 = vld [vmem:[#allocation5_spill] sm:$0xff] }
 0x285   : > { %v5453_v27 = vpop.f32.mrf.mxu1  ;;  %v5457_v26 = vpop.f32.mrf.mxu0  ;;  %v2428_v34 = vadd.f32 %v5677_v28, %v2280_v30 }
 0x286   : > { %5676 = vst [vmem:[#allocation20_spill] sm:$0xff] %v5457_v26  ;;  %v2677_v26 = vadd.f32 %v2614_v12, %v2551_v50  ;;  %v2681_v50 = vadd.f32 %v5415_v57, %v2555_v38  ;;  %v2561_v57 = vadd.f32 %v5429_v16, %v5391_v1  ;;  %v2559_v3 = vadd.f32 %v5433_v2, %v2427_v21  ;;  %v5679_v38 = vld [vmem:[#allocation3_spill] sm:$0xff] }
 0x287   : > { %v5459_v35 = vpop.f32.mrf.mxu1  ;;  %v4140_v61 = vpop.f32.mrf.mxu0  ;;  %v2283_v16 = vadd.f32 %v5403_v17, %v5353_v29 }
 0x289   : > { %v5466_v56 = vpop.f32.mrf.mxu1  ;;  %v2894_v23 = vpop.f32.mrf.mxu0 }
 0x28b   : > { %v4122_v43 = vpop.f32.mrf.mxu1  ;;  %v4141_v37 = vpop.f32.mrf.mxu0 }
 0x28c   : > { %v2827_v40 = vadd.f32 %v4122_v43, %v2679_v11 }
 0x28d   : > { %v2762_v63 = vpop.f32.mrf.mxu1  ;;  %v2897_v24 = vpop.f32.mrf.mxu0 }
 0x28e   : > { %v2959_v22 = vadd.f32 %v4140_v61, %v2827_v40  ;;  %v2825_v10 = vadd.f32 %v2762_v63, %v2677_v26  ;;  %v2282_v26 = vadd.f32 %v5395_v4, %v5346_v44 }
 0x28f   : > { %v4123_v12 = vpop.f32.mrf.mxu1  ;;  %v4144_v6 = vpop.f32.mrf.mxu0 }
 0x290   : > { %v2957_v5 = vadd.f32 %v2894_v23, %v2825_v10  ;;  %v2828_v60 = vadd.f32 %v4123_v12, %v2680_v13  ;;  %v2982_v20 = vadd.f32 %v5478_v52, %v2959_v22  ;;  %v5678_v22 = vld [vmem:[#allocation12_spill] sm:$0xff]  ;;  %v5680_v12 = vld [vmem:[#allocation10_spill] sm:$0xff] }
 0x291   : > { %v2765_v54 = vpop.f32.mrf.mxu1  ;;  %v2910_v36 = vpop.f32.mrf.mxu0  ;;  %v2687_v48 = vadd.f32 %v5678_v22, %v2561_v57  ;;  %v5689_v57 = vld [vmem:[#allocation9_spill] sm:$0xff] }
 0x292   : > { %v2960_v53 = vadd.f32 %v4141_v37, %v2828_v60  ;;  %v2826_v31 = vadd.f32 %v2765_v54, %v2678_v55  ;;  %v2980_v49 = vadd.f32 %v5478_v52, %v2957_v5  ;;  %v2430_v37 = vadd.f32 %v5387_v47, %v2282_v26  ;;  %v5681_v5 = vld [vmem:[#allocation4_spill] sm:$0xff]  ;;  %v5682_v60 = vld [vmem:[#allocation11_spill] sm:$0xff] }
 0x293   : > { %v4126_v61 = vpop.f32.mrf.mxu1  ;;  %v4145_v46 = vpop.f32.mrf.mxu0  ;;  %v2998_v41 = vmax.f32 %v2982_v20, 0.0  ;;  %v2286_v55 = vadd.f32 %v5680_v12, %v5679_v38  ;;  %v5684_v20 = vld [vmem:[#allocation6_spill] sm:$0xff] }
 0x294   : > { %v2983_v19 = vadd.f32 %v5478_v52, %v2960_v53  ;;  %v2958_v44 = vadd.f32 %v2897_v24, %v2826_v31  ;;  %v2831_v4 = vadd.f32 %v4126_v61, %v2683_v32  ;;  %v2996_v42 = vmax.f32 %v2980_v49, 0.0  ;;  %v5685_v31 = vld [vmem:[#allocation14_spill] sm:$0xff]  ;;  %v5687_v49 = vld [vmem:[#allocation8_spill] sm:$0xff] }
 0x295   : > { %v2778_v62 = vpop.f32.mrf.mxu1  ;;  %v2913_v43 = vpop.f32.mrf.mxu0  ;;  %v2562_v58 = vadd.f32 %v5437_v25, %v2430_v37  ;;  %v5683_v25 = vld [vmem:[#allocation13_spill] sm:$0xff]  ;;  %v2431_v53 = vadd.f32 %v5684_v20, %v2283_v16  ;;  %v5688_v37 = vld [vmem:[#allocation7_spill] sm:$0xff] }
 0x296   : > { %v2999_v11 = vmax.f32 %v2983_v19, 0.0  ;;  %v2981_v8 = vadd.f32 %v5478_v52, %v2958_v44  ;;  %v2829_v23 = vadd.f32 %v2778_v62, %v2681_v50  ;;  %v2963_v47 = vadd.f32 %v4144_v6, %v2831_v4  ;;  %v5686_v50 = vld [vmem:[#allocation17_spill] sm:$0xff] }
 0x297   : > { %v4127_v40 = vpop.f32.mrf.mxu1  ;;  %v4148_v1 = vpop.f32.mrf.mxu0  ;;  %v2284_v6 = vadd.f32 %v5682_v60, %v5681_v5  ;;  %v2685_v15 = vadd.f32 %v5683_v25, %v2559_v3  ;;  %v2560_v7 = vadd.f32 %v5686_v50, %v2428_v34  ;;  %v2565_v19 = vadd.f32 %v5447_v14, %v5687_v49  ;;  %v5692_v34 = vld [vmem:[#allocation18_spill] sm:$0xff]  ;;  %v5694_v25 = vld [vmem:[#allocation20_spill] sm:$0xff] }
 0x298   : > { %v3013_v18 = vpack.c.bf16 %v2999_v11, %v2998_v41  ;;  %v2997_v51 = vmax.f32 %v2981_v8, 0.0  ;;  %v2961_v59 = vadd.f32 %v2910_v36, %v2829_v23  ;;  %v2832_v63 = vadd.f32 %v4127_v40, %v2684_v45 }
 0x299   : > { %v2781_v13 = vpop.f32.mrf.mxu1  ;;  %v2926_v24 = vpop.f32.mrf.mxu0  ;;  %v2986_v9 = vadd.f32 %v5478_v52, %v2963_v47  ;;  %v2688_v36 = vadd.f32 %v5685_v31, %v2562_v58  ;;  %v2434_v30 = vadd.f32 %v5688_v37, %v2286_v55  ;;  %v2432_v62 = vadd.f32 %v5689_v57, %v2284_v6  ;;  %v5690_v47 = vld [vmem:[#allocation15_spill] sm:$0xff] }
 0x29a   : > { %v3012_v10 = vpack.c.bf16 %v2997_v51, %v2996_v42  ;;  %v2830_v2 = vadd.f32 %v2781_v13, %v2682_v39  ;;  %v2964_v29 = vadd.f32 %v4145_v46, %v2832_v63  ;;  %v2984_v0 = vadd.f32 %v5478_v52, %v2961_v59  ;;  %v5691_v59 = vld [vmem:[#allocation16_spill] sm:$0xff] }
 0x29b   : > { %v4130_v17 = vpop.f32.mrf.mxu1  ;;  %v4149_v32 = vpop.f32.mrf.mxu0  ;;  %v3002_v41 = vmax.f32 %v2986_v9, 0.0  ;;  %v2563_v23 = vadd.f32 %v5453_v27, %v2431_v53  ;;  %v2686_v14 = vadd.f32 %v5690_v47, %v2560_v7  ;;  %v2566_v40 = vadd.f32 %v5459_v35, %v2434_v30  ;;  %v5693_v35 = vld [vmem:[#allocation19_spill] sm:$0xff] }
 0x29c   : > { %v2962_v26 = vadd.f32 %v2913_v43, %v2830_v2  ;;  %v2835_v54 = vadd.f32 %v4130_v17, %v2687_v48  ;;  %4156 = vmatprep.mubr.msk.bf16.mxu1 %vm1638_vm14, %v3012_v10  ;;  %v2987_v33 = vadd.f32 %v5478_v52, %v2964_v29  ;;  %v3000_v43 = vmax.f32 %v2984_v0, 0.0 }
 0x29d   : > { %v2794_v61 = vpop.f32.mrf.mxu1  ;;  %4157 = vmatmul.mubr.msk.bf16.vlgmr.msra.gmra.mxu1 %vm1638_vm14, %v3013_v18  ;;  %v2929_v21 = vpop.f32.mrf.mxu0  ;;  %v2689_v22 = vadd.f32 %v5692_v34, %v2563_v23  ;;  %v2564_v48 = vadd.f32 %v5466_v56, %v2432_v62 }
 0x29e   : > { %v2985_v44 = vadd.f32 %v5478_v52, %v2962_v26  ;;  %v2967_v4 = vadd.f32 %v4148_v1, %v2835_v54  ;;  %v2833_v46 = vadd.f32 %v2794_v61, %v2685_v15  ;;  %v3003_v11 = vmax.f32 %v2987_v33, 0.0 }
 0x29f   : > { %v4131_v8 = vpop.f32.mrf.mxu1  ;;  %v4152_v3 = vpop.f32.mrf.mxu0  ;;  %v2691_v1 = vadd.f32 %v5691_v59, %v2565_v19  ;;  %v2690_v15 = vadd.f32 %v5694_v25, %v2564_v48 }
 0x2a0   : > { %v3001_v45 = vmax.f32 %v2985_v44, 0.0  ;;  %v2836_v39 = vadd.f32 %v4131_v8, %v2688_v36  ;;  %v3015_v42 = vpack.c.bf16 %v3003_v11, %v3002_v41  ;;  %v2965_v18 = vadd.f32 %v2926_v24, %v2833_v46 }
 0x2a1   : > { %v2797_v51 = vpop.f32.mrf.mxu1  ;;  %v2990_v58 = vadd.f32 %v5478_v52, %v2967_v4  ;;  %v2942_v27 = vpop.f32.mrf.mxu0  ;;  %v2692_v24 = vadd.f32 %v5693_v35, %v2566_v40 }
 0x2a2   : > { %v3014_v16 = vpack.c.bf16 %v3001_v45, %v3000_v43  ;;  %v2968_v63 = vadd.f32 %v4149_v32, %v2836_v39  ;;  %v2834_v13 = vadd.f32 %v2797_v51, %v2686_v14  ;;  %v2988_v38 = vadd.f32 %v5478_v52, %v2965_v18 }
 0x2a3   : > { %v4134_v28 = vpop.f32.mrf.mxu1  ;;  %v3006_v5 = vmax.f32 %v2990_v58, 0.0  ;;  %v4153_v17 = vpop.f32.mrf.mxu0 }
 0x2a4   : > { %v2991_v10 = vadd.f32 %v5478_v52, %v2968_v63  ;;  %v2839_v2 = vadd.f32 %v4134_v28, %v2691_v1  ;;  %4160 = vmatprep.mubr.msk.bf16.mxu1 %vm1638_vm14, %v3014_v16  ;;  %v2966_v12 = vadd.f32 %v2929_v21, %v2834_v13  ;;  %v3004_v32 = vmax.f32 %v2988_v38, 0.0 }
 0x2a5   : > { %v2810_v55 = vpop.f32.mrf.mxu1  ;;  %4161 = vmatmul.mubr.msk.bf16.gmra.mxu1 %vm1638_vm14, %v3015_v42  ;;  %v2945_v33 = vpop.f32.mrf.mxu0 }
 0x2a6   : > { %v3007_v60 = vmax.f32 %v2991_v10, 0.0  ;;  %v2971_v6 = vadd.f32 %v4152_v3, %v2839_v2  ;;  %v2837_v9 = vadd.f32 %v2810_v55, %v2689_v22  ;;  %v2989_v29 = vadd.f32 %v5478_v52, %v2966_v12  ;;  %v5556_v3 = vld [vmem:[%s5643_s6] ss:$0 sm:$0xff] }
 0x2a7   : > { %v4135_v56 = vpop.f32.mrf.mxu1  ;;  %v4176_v62 = vpop.f32.mrf.mxu0 }
 0x2a8   : > { %v3017_v0 = vpack.c.bf16 %v3007_v60, %v3006_v5  ;;  %v2969_v26 = vadd.f32 %v2942_v27, %v2837_v9  ;;  %v2840_v54 = vadd.f32 %v4135_v56, %v2692_v24  ;;  %v3005_v20 = vmax.f32 %v2989_v29, 0.0 }
 0x2a9   : > { %v2813_v53 = vpop.f32.mrf.mxu1  ;;  %v2994_v31 = vadd.f32 %v5478_v52, %v2971_v6  ;;  %v3280_v41 = vpop.f32.mrf.mxu0 }
 0x2aa   : > { %v2972_v36 = vadd.f32 %v4153_v17, %v2840_v54  ;;  %v2838_v50 = vadd.f32 %v2813_v53, %v2690_v15  ;;  %v3016_v7 = vpack.c.bf16 %v3005_v20, %v3004_v32  ;;  %v2992_v61 = vadd.f32 %v5478_v52, %v2969_v26 }
 0x2ab   : > { %v3010_v44 = vmax.f32 %v2994_v31, 0.0  ;;  %v4177_v11 = vpop.f32.mrf.mxu0 }
 0x2ac   : > { %v2995_v49 = vadd.f32 %v5478_v52, %v2972_v36  ;;  %v2970_v19 = vadd.f32 %v2945_v33, %v2838_v50  ;;  %4164 = vmatprep.mubr.msk.bf16.mxu1 %vm1638_vm14, %v3016_v7  ;;  %v3008_v21 = vmax.f32 %v2992_v61, 0.0 }
 0x2ad   : > { %4165 = vmatmul.mubr.msk.bf16.gmra.mxu1 %vm1638_vm14, %v3017_v0  ;;  %v3283_v8 = vpop.f32.mrf.mxu0 }
 0x2ae   : > { %v3011_v4 = vmax.f32 %v2995_v49, 0.0  ;;  %v2993_v46 = vadd.f32 %v5478_v52, %v2970_v19  ;;  %v5551_v52 = vld [vmem:[%s5645_s8] ss:$0 sm:$0xff] }
 0x2af   : > { %v4180_v23 = vpop.f32.mrf.mxu0  ;;  %v3289_v47 = vadd.f32 %v4176_v62, %v5551_v52  ;;  %v3281_v51 = vadd.f32 %v5551_v52, %v3280_v41  ;;  %v3292_v63 = vadd.f32 %v4177_v11, %v5551_v52  ;;  %v3284_v34 = vadd.f32 %v5551_v52, %v3283_v8 }
 0x2b0   : > { %v3019_v37 = vpack.c.bf16 %v3011_v4, %v3010_v44  ;;  %v3009_v30 = vmax.f32 %v2993_v46, 0.0  ;;  %v3305_v22 = vadd.f32 %v4180_v23, %v5551_v52 }
 0x2b1   : > { %v3296_v43 = vpop.f32.mrf.mxu0 }
 0x2b2   : > { %v3018_v57 = vpack.c.bf16 %v3009_v30, %v3008_v21  ;;  %v3297_v9 = vadd.f32 %v5551_v52, %v3296_v43 }
 0x2b3   : > { %v4181_v45 = vpop.f32.mrf.mxu0 }
 0x2b4   : > { %4168 = vmatprep.mubr.msk.bf16.mxu1 %vm1638_vm14, %v3018_v57  ;;  %v3308_v0 = vadd.f32 %v4181_v45, %v5551_v52 }
 0x2b5   : > { %4169 = vmatmul.mubr.msk.bf16.gmra.mxu1 %vm1638_vm14, %v3019_v37  ;;  %v3299_v39 = vpop.f32.mrf.mxu0 }
 0x2b6   : > { %v3300_v36 = vadd.f32 %v5551_v52, %v3299_v39 }
 0x2b7   : > { %v4184_v40 = vpop.f32.mrf.mxu0 }
 0x2b8   : > { %v3321_v19 = vadd.f32 %v4184_v40, %v5551_v52 }
 0x2b9   : > { %v3312_v58 = vpop.f32.mrf.mxu0 }
 0x2ba   : > { %v3313_v11 = vadd.f32 %v5551_v52, %v3312_v58 }
 0x2bb   : > { %v4185_v12 = vpop.f32.mrf.mxu0 }
 0x2bd   : > { %v3315_v54 = vpop.f32.mrf.mxu0 }
 0x2bf   : > { %v4188_v44 = vpop.f32.mrf.mxu0 }
 0x2c1   : > { %v3328_v43 = vpop.f32.mrf.mxu0 }
 0x35d   : > { %v4158_v14 = vpop.f32.mrf.mxu1 }
 0x35e   : > { %v3098_v42 = vadd.f32 %v4158_v14, %v5556_v3 }
 0x35f   : > { %v3089_v18 = vpop.f32.mrf.mxu1 }
 0x360   : > { %v3345_v59 = vadd.f32 %v3289_v47, %v3098_v42  ;;  %v3090_v1 = vadd.f32 %v5556_v3, %v3089_v18  ;;  %v3324_v47 = vadd.f32 %v4185_v12, %v5551_v52  ;;  %v3316_v18 = vadd.f32 %v5551_v52, %v3315_v54 }
 0x361   : > { %v4159_v16 = vpop.f32.mrf.mxu1 }
 0x362   : > { %v3361_v13 = vmax.f32 %v3345_v59, 0.0  ;;  %v3343_v28 = vadd.f32 %v3281_v51, %v3090_v1  ;;  %v3101_v27 = vadd.f32 %v4159_v16, %v5556_v3  ;;  %v3337_v51 = vadd.f32 %v4188_v44, %v5551_v52 }
 0x363   : > { %v3092_v48 = vpop.f32.mrf.mxu1 }
 0x364   : > { %v3828_v10 = vpack.c.bf16 %v3361_v13, %v3361_v13  ;;  %v3359_v2 = vmax.f32 %v3343_v28, 0.0  ;;  %v3346_v35 = vadd.f32 %v3292_v63, %v3101_v27  ;;  %v3093_v24 = vadd.f32 %v5556_v3, %v3092_v48  ;;  %v4189_v13 = vpop.f32.mrf.mxu0 }
 0x365   : > { %v4162_v38 = vpop.f32.mrf.mxu1 }
 0x366   : > { %3442 = vst.msk [vmem:[%s4415_s26 + $0x8] sm:$0xf] %vm3439_vm3, %v3828_v10  ;;  %v3826_v55 = vpack.c.bf16 %v3359_v2, %v3359_v2  ;;  %v3362_v5 = vmax.f32 %v3346_v35, 0.0  ;;  %v3344_v60 = vadd.f32 %v3284_v34, %v3093_v24  ;;  %v3114_v6 = vadd.f32 %v4162_v38, %v5556_v3  ;;  %v3331_v12 = vpop.f32.mrf.mxu0 }
 0x367   : > { %v3105_v29 = vpop.f32.mrf.mxu1  ;;  %v3329_v10 = vadd.f32 %v5551_v52, %v3328_v43 }
 0x368   : > { %3440 = vst.msk [vmem:[%s4415_s26] sm:$0xf] %vm3439_vm3, %v3826_v55  ;;  %v3829_v56 = vpack.c.bf16 %v3362_v5, %v3362_v5  ;;  %v3360_v17 = vmax.f32 %v3344_v60, 0.0  ;;  %v3349_v25 = vadd.f32 %v3305_v22, %v3114_v6  ;;  %v3106_v15 = vadd.f32 %v5556_v3, %v3105_v29 }
 0x369   : > { %v4163_v26 = vpop.f32.mrf.mxu1  ;;  %v3340_v5 = vadd.f32 %v4189_v13, %v5551_v52 }
 0x36a   : > { %3443 = vst.msk [vmem:[%s4415_s26 + $0xc] sm:$0xf] %vm3439_vm3, %v3829_v56  ;;  %v3827_v32 = vpack.c.bf16 %v3360_v17, %v3360_v17  ;;  %v3365_v20 = vmax.f32 %v3349_v25, 0.0  ;;  %v3347_v53 = vadd.f32 %v3297_v9, %v3106_v15  ;;  %v3117_v31 = vadd.f32 %v4163_v26, %v5556_v3 }
 0x36b   : > { %v3108_v50 = vpop.f32.mrf.mxu1  ;;  %v3332_v17 = vadd.f32 %v5551_v52, %v3331_v12 }
 0x36c   : > { %3441 = vst.msk [vmem:[%s4415_s26 + $0x4] sm:$0xf] %vm3439_vm3, %v3827_v32  ;;  %v3832_v7 = vpack.c.bf16 %v3365_v20, %v3365_v20  ;;  %v3363_v33 = vmax.f32 %v3347_v53, 0.0  ;;  %v3350_v61 = vadd.f32 %v3308_v0, %v3117_v31  ;;  %v3109_v49 = vadd.f32 %v5556_v3, %v3108_v50 }
 0x36d   : > { %v4166_v37 = vpop.f32.mrf.mxu1 }
 0x36e   : > { %3446 = vst.msk [vmem:[%s4415_s26 + $0x18] sm:$0xf] %vm3439_vm3, %v3832_v7  ;;  %v3830_v4 = vpack.c.bf16 %v3363_v33, %v3363_v33  ;;  %v3366_v46 = vmax.f32 %v3350_v61, 0.0  ;;  %v3348_v21 = vadd.f32 %v3300_v36, %v3109_v49  ;;  %v3130_v30 = vadd.f32 %v4166_v37, %v5556_v3 }
 0x36f   : > { %v3121_v41 = vpop.f32.mrf.mxu1 }
 0x370   : > { %3444 = vst.msk [vmem:[%s4415_s26 + $0x10] sm:$0xf] %vm3439_vm3, %v3830_v4  ;;  %v3833_v57 = vpack.c.bf16 %v3366_v46, %v3366_v46  ;;  %v3364_v62 = vmax.f32 %v3348_v21, 0.0  ;;  %v3353_v8 = vadd.f32 %v3321_v19, %v3130_v30  ;;  %v3122_v23 = vadd.f32 %v5556_v3, %v3121_v41 }
 0x371   : > { %v4167_v39 = vpop.f32.mrf.mxu1 }
 0x372   : > { %3447 = vst.msk [vmem:[%s4415_s26 + $0x1c] sm:$0xf] %vm3439_vm3, %v3833_v57  ;;  %v3831_v45 = vpack.c.bf16 %v3364_v62, %v3364_v62  ;;  %v3369_v14 = vmax.f32 %v3353_v8, 0.0  ;;  %v3351_v40 = vadd.f32 %v3313_v11, %v3122_v23  ;;  %v3133_v42 = vadd.f32 %v4167_v39, %v5556_v3 }
 0x373   : > { %v3124_v59 = vpop.f32.mrf.mxu1 }
 0x374   : > { %3445 = vst.msk [vmem:[%s4415_s26 + $0x14] sm:$0xf] %vm3439_vm3, %v3831_v45  ;;  %v3836_v1 = vpack.c.bf16 %v3369_v14, %v3369_v14  ;;  %v3367_v16 = vmax.f32 %v3351_v40, 0.0  ;;  %v3354_v58 = vadd.f32 %v3324_v47, %v3133_v42  ;;  %v3125_v63 = vadd.f32 %v5556_v3, %v3124_v59 }
 0x375   : > { %v4170_v28 = vpop.f32.mrf.mxu1 }
 0x376   : > { %3450 = vst.msk [vmem:[%s4415_s26 + $0x28] sm:$0xf] %vm3439_vm3, %v3836_v1  ;;  %v3834_v27 = vpack.c.bf16 %v3367_v16, %v3367_v16  ;;  %v3370_v34 = vmax.f32 %v3354_v58, 0.0  ;;  %v3352_v22 = vadd.f32 %v3316_v18, %v3125_v63  ;;  %v3146_v48 = vadd.f32 %v4170_v28, %v5556_v3 }
 0x377   : > { %v3137_v2 = vpop.f32.mrf.mxu1 }
 0x378   : > { %3448 = vst.msk [vmem:[%s4415_s26 + $0x20] sm:$0xf] %vm3439_vm3, %v3834_v27  ;;  %v3837_v35 = vpack.c.bf16 %v3370_v34, %v3370_v34  ;;  %v3368_v24 = vmax.f32 %v3352_v22, 0.0  ;;  %v3357_v38 = vadd.f32 %v3337_v51, %v3146_v48  ;;  %v3138_v55 = vadd.f32 %v5556_v3, %v3137_v2 }
 0x379   : > { %v4171_v60 = vpop.f32.mrf.mxu1 }
 0x37a   : > { %3451 = vst.msk [vmem:[%s4415_s26 + $0x2c] sm:$0xf] %vm3439_vm3, %v3837_v35  ;;  %v3835_v6 = vpack.c.bf16 %v3368_v24, %v3368_v24  ;;  %v3373_v9 = vmax.f32 %v3357_v38, 0.0  ;;  %v3355_v29 = vadd.f32 %v3329_v10, %v3138_v55  ;;  %v3149_v56 = vadd.f32 %v4171_v60, %v5556_v3 }
 0x37b   : > { %v3140_v25 = vpop.f32.mrf.mxu1 }
 0x37c   : > { %3449 = vst.msk [vmem:[%s4415_s26 + $0x24] sm:$0xf] %vm3439_vm3, %v3835_v6  ;;  %v3840_v15 = vpack.c.bf16 %v3373_v9, %v3373_v9  ;;  %v3371_v0 = vmax.f32 %v3355_v29, 0.0  ;;  %v3358_v26 = vadd.f32 %v3340_v5, %v3149_v56  ;;  %v3141_v54 = vadd.f32 %v5556_v3, %v3140_v25 }
 0x37e   : > { %3454 = vst.msk [vmem:[%s4415_s26 + $0x38] sm:$0xf] %vm3439_vm3, %v3840_v15  ;;  %v3838_v32 = vpack.c.bf16 %v3371_v0, %v3371_v0  ;;  %v3374_v20 = vmax.f32 %v3358_v26, 0.0  ;;  %v3356_v53 = vadd.f32 %v3332_v17, %v3141_v54 }
 0x380   : > { %3452 = vst.msk [vmem:[%s4415_s26 + $0x30] sm:$0xf] %vm3439_vm3, %v3838_v32  ;;  %v3841_v31 = vpack.c.bf16 %v3374_v20, %v3374_v20  ;;  %v3372_v36 = vmax.f32 %v3356_v53, 0.0 }
 0x382   : > { %3455 = vst.msk [vmem:[%s4415_s26 + $0x3c] sm:$0xf] %vm3439_vm3, %v3841_v31  ;;  %v3839_v52 = vpack.c.bf16 %v3372_v36, %v3372_v36 }
 0x384   : > { %3453 = vst.msk [vmem:[%s4415_s26 + $0x34] sm:$0xf] %vm3439_vm3, %v3839_v52 }
 0x385 PF: > { %s19_s13 = sadd.s32 1, %s4321_s13   ;;  %s5695_s30 = smov %s4313_s11 }
 0x386   : > { %p16_p8 = scmp.ge.s32.totalorder %s19_s13, 6   ;;  %s5696_s10 = smov %s4317_s12 }
 0x387   : > { %s5697_s11 = smov %s5700_s14  ;;  %s5698_s12 = smov %s5704_s15 }
 0x388   :  { %18 = sbr.rel (!%p16_p8) target bundleno = 3 (0x3), region = 102 }

</bundles_post_ra>
